<compile_context>
chip_gen: v7x
topology: tpu7x:2x2x1
jax: 0.10.0
libtpu: 0.0.40
codegen_flags: <defaults>
</compile_context>

<pallas_src>
import jax
import jax.numpy as jnp
from jax.experimental import pallas as pl
from jax.experimental.pallas import tpu as pltpu


# ----------------------------------------------------------------------------
# Fused kernel: GCN layer 1 + relu + GCN layer 2 + edge MLP (pos+neg edges).
# Single invocation (no grid): every operand is a full-array VMEM block.
# ----------------------------------------------------------------------------
def _double_gcn_kernel(a_ref, x_ref, w1_ref, w2_ref, g_ref, pw1_ref, pw2_ref,
                       bias_ref, o_ref):
    n = a_ref.shape[0]                       # nodes
    n_rel = a_ref.shape[1] // n              # relations (static)
    hid = w1_ref.shape[1] // n_rel           # 256
    out = w2_ref.shape[1] // n_rel           # 64
    e_pad = g_ref.shape[0] // 2              # padded edge count

    biases = bias_ref[...]                   # [4, hid] f32 (packed)
    b1 = biases[0:1, :hid]                   # sum_r b1_r        [1, hid]
    b2 = biases[1:2, :out]                   # sum_r b2_r        [1, out]
    pb1 = biases[2:3, :out]                  # predictor b1      [1, out]
    pb2 = biases[3:4, 0:1]                   # predictor b2      [1, 1]

    # ---- layer 1:  h1 = relu( sum_r A_r @ (X @ W1_r) + sum_r b1_r )
    xw = jnp.dot(x_ref[...], w1_ref[...],                     # one pass, K = 512
                 preferred_element_type=jnp.float32)          # [N, R*hid] f32
    xw_stk = jnp.concatenate(                                  # restack along sublanes
        [xw[:, r * hid:(r + 1) * hid] for r in range(n_rel)],
        axis=0).astype(jnp.bfloat16)                           # [R*N, hid] bf16
    h1 = jnp.dot(a_ref[...], xw_stk,                           # K = R*N = 128
                 preferred_element_type=jnp.float32) + b1      # [N, hid] f32
    h1 = jnp.maximum(h1, 0.0).astype(jnp.bfloat16)             # [N, hid] bf16

    # ---- layer 2:  h2 = sum_r A_r @ (h1 @ W2_r) + sum_r b2_r
    hw = jnp.dot(h1, w2_ref[...],                              # one pass, K = 256
                 preferred_element_type=jnp.float32)           # [N, R*out] f32
    hw_stk = jnp.concatenate(
        [hw[:, r * out:(r + 1) * out] for r in range(n_rel)],
        axis=0).astype(jnp.bfloat16)                           # [R*N, out] bf16
    h2 = (jnp.dot(a_ref[...], hw_stk,
                  preferred_element_type=jnp.float32) + b2     # [N, out] f32
          ).astype(jnp.bfloat16)                               # [N, out] bf16

    # ---- MLPPredictor on all (pos+neg, padded) edges; gather via one one-hot matmul
    hg = jnp.dot(g_ref[...], h2,                               # [2*E_pad, out] f32
                 preferred_element_type=jnp.float32)
    h_edge = jnp.concatenate([hg[:e_pad], hg[e_pad:]],         # [E_pad, 2*out] = [hs||hd]
                             axis=1).astype(jnp.bfloat16)
    z = jnp.dot(h_edge, pw1_ref[...],                          # K = 128
                preferred_element_type=jnp.float32) + pb1      # [E_pad, out] f32
    z = jnp.maximum(z, 0.0)

    # final Linear(out -> 1), written as a lane-dense (1, E_pad) row
    zt = z.T                                                   # [out, E_pad]
    s = jnp.sum(zt * pw2_ref[...], axis=0, keepdims=True)      # [1, E_pad]
    o_ref[...] = (s + pb2).astype(o_ref.dtype)


# ----------------------------------------------------------------------------
# One-time packing (outside the per-call hot path): bf16 weights, concatenated
# per-relation weights, pre-summed biases, fused gather matrix, padded edges.
# ----------------------------------------------------------------------------
def prepare_params(raw, n_rel):
    bf = lambda t: t.astype(jnp.bfloat16)
    in_feat, hid = raw["gc1_w"].shape[1], raw["gc1_w"].shape[2]
    out = raw["gc2_w"].shape[2]
    w1_cat = bf(jnp.transpose(raw["gc1_w"], (1, 0, 2)).reshape(in_feat, n_rel * hid))
    w2_cat = bf(jnp.transpose(raw["gc2_w"], (1, 0, 2)).reshape(hid, n_rel * out))
    pw1 = bf(jnp.concatenate([raw["pred_w1a"], raw["pred_w1b"]], axis=0))  # [2*out, out]
    pw2 = raw["pred_w2"].astype(jnp.float32)                               # [out, 1]
    biases = jnp.zeros((4, hid), jnp.float32)
    biases = biases.at[0, :hid].set(raw["gc1_b"].sum(axis=0)[0])
    biases = biases.at[1, :out].set(raw["gc2_b"].sum(axis=0)[0])
    biases = biases.at[2, :out].set(raw["pred_b1"][0])
    biases = biases.at[3, 0].set(raw["pred_b2"][0, 0])
    return {"w1_cat": w1_cat, "w2_cat": w2_cat, "pw1": pw1, "pw2": pw2, "biases": biases}


def prepare_graph(a_norm, pos_edges, neg_edges, pad_to=128):
    n_rel, n, _ = a_norm.shape
    a_cat = jnp.transpose(a_norm, (1, 0, 2)).reshape(n, n_rel * n).astype(jnp.bfloat16)
    e_tot = pos_edges.shape[0] + neg_edges.shape[0]
    e_pad = max(pad_to, ((e_tot + pad_to - 1) // pad_to) * pad_to)
    edges = jnp.concatenate(
        [pos_edges, neg_edges, jnp.zeros((e_pad - e_tot, 2), jnp.int32)], axis=0)
    g_src = jax.nn.one_hot(edges[:, 0], n, dtype=jnp.bfloat16)             # [E_pad, N]
    g_dst = jax.nn.one_hot(edges[:, 1], n, dtype=jnp.bfloat16)             # [E_pad, N]
    g_all = jnp.concatenate([g_src, g_dst], axis=0)                        # [2*E_pad, N]
    return {"a_cat": a_cat, "g_all": g_all}


# ----------------------------------------------------------------------------
# Forward: one fused pallas_call; the only per-call glue is the x -> bf16 cast.
# ----------------------------------------------------------------------------
def double_gcn_forward(graph, params, x, *, n_pos, n_neg):
    x_bf = x.astype(jnp.bfloat16)
    operands = (graph["a_cat"], x_bf, params["w1_cat"], params["w2_cat"],
                graph["g_all"], params["pw1"], params["pw2"], params["biases"])

    n, rn = graph["a_cat"].shape
    n_rel = rn // n
    in_feat = x.shape[1]
    hid = params["w1_cat"].shape[1] // n_rel
    out = params["w2_cat"].shape[1] // n_rel
    e_pad = graph["g_all"].shape[0] // 2

    flops = 2 * (n * in_feat * n_rel * hid        # X @ W1_cat
                 + n * rn * hid                   # A_cat @ xw_stk
                 + n * hid * n_rel * out          # h1 @ W2_cat
                 + n * rn * out                   # A_cat @ hw_stk
                 + 2 * e_pad * n * out            # gather matmul
                 + e_pad * 2 * out * out          # edge MLP layer 1
                 + e_pad * out)                   # final reduce
    bytes_accessed = int(sum(int(op.size) * op.dtype.itemsize for op in operands)
                         + e_pad * 4)

    scores = pl.pallas_call(
        _double_gcn_kernel,
        out_shape=jax.ShapeDtypeStruct((1, e_pad), jnp.float32),
        in_specs=[pl.BlockSpec(memory_space=pltpu.MemorySpace.VMEM)] * len(operands),
        out_specs=pl.BlockSpec(memory_space=pltpu.MemorySpace.VMEM),
        cost_estimate=pl.CostEstimate(flops=int(flops), transcendentals=0,
                                      bytes_accessed=bytes_accessed),
    )(*operands)

    row = scores[0]
    return row[:n_pos], row[n_pos:n_pos + n_neg]


# ----------------------------------------------------------------------------
# Pure-JAX reference (mirrors the kernel's bf16 cast points) for a correctness check.
# ----------------------------------------------------------------------------
def reference_forward(raw, a_norm, pos_edges, neg_edges, x):
    bf = jnp.bfloat16
    n_rel = a_norm.shape[0]
    a = a_norm.astype(bf)
    xb = x.astype(bf)
    acc = raw["gc1_b"].sum(axis=0)
    for r in range(n_rel):
        xw = jnp.dot(xb, raw["gc1_w"][r].astype(bf), preferred_element_type=jnp.float32)
        acc = acc + jnp.dot(a[r], xw.astype(bf), preferred_element_type=jnp.float32)
    h1 = jnp.maximum(acc, 0.0).astype(bf)
    acc2 = raw["gc2_b"].sum(axis=0)
    for r in range(n_rel):
        hw = jnp.dot(h1, raw["gc2_w"][r].astype(bf), preferred_element_type=jnp.float32)
        acc2 = acc2 + jnp.dot(a[r], hw.astype(bf), preferred_element_type=jnp.float32)
    h2 = acc2.astype(bf)
    edges = jnp.concatenate([pos_edges, neg_edges], axis=0)
    hs = h2[edges[:, 0]].astype(jnp.float32)
    hd = h2[edges[:, 1]].astype(jnp.float32)
    he = jnp.concatenate([hs, hd], axis=1).astype(bf)
    w1 = jnp.concatenate([raw["pred_w1a"], raw["pred_w1b"]], axis=0).astype(bf)
    z = jnp.dot(he, w1, preferred_element_type=jnp.float32) + raw["pred_b1"]
    z = jnp.maximum(z, 0.0)
    s = (z @ raw["pred_w2"] + raw["pred_b2"])[:, 0]
    n_pos = pos_edges.shape[0]
    return s[:n_pos], s[n_pos:]


# ----------------------------------------------------------------------------
# Deterministic setup
# ----------------------------------------------------------------------------
def build_norm_adjacency(key, n_rel, n):
    """Dense per-relation adjacency with GraphConv norm='both' normalization.
    A[r, dst, src] = 1 if edge src->dst in relation r."""
    a = jax.random.bernoulli(key, p=0.15, shape=(n_rel, n, n)).astype(jnp.float32)
    deg_in = jnp.clip(a.sum(axis=2, keepdims=True), 1.0)
    deg_out = jnp.clip(a.sum(axis=1, keepdims=True), 1.0)
    return a * jax.lax.rsqrt(deg_in) * jax.lax.rsqrt(deg_out)


def init_params(key, rel_names, in_feat=512, hid_feat=256, out_feat=64):
    n_rel = len(rel_names)
    ks = jax.random.split(key, 8)
    scale = lambda fan_in: 1.0 / jnp.sqrt(jnp.float32(fan_in))
    return {
        "gc1_w": jax.random.normal(ks[0], (n_rel, in_feat, hid_feat), jnp.float32) * scale(in_feat),
        "gc1_b": jnp.zeros((n_rel, 1, hid_feat), jnp.float32),
        "gc2_w": jax.random.normal(ks[1], (n_rel, hid_feat, out_feat), jnp.float32) * scale(hid_feat),
        "gc2_b": jnp.zeros((n_rel, 1, out_feat), jnp.float32),
        "pred_w1a": jax.random.normal(ks[2], (out_feat, out_feat), jnp.float32) * scale(2 * out_feat),
        "pred_w1b": jax.random.normal(ks[3], (out_feat, out_feat), jnp.float32) * scale(2 * out_feat),
        "pred_b1": jnp.zeros((1, out_feat), jnp.float32),
        "pred_w2": jax.random.normal(ks[4], (out_feat, 1), jnp.float32) * scale(out_feat),
        "pred_b2": jnp.zeros((1, 1), jnp.float32),
    }


if __name__ == "__main__":
    rel_names = ["rel_a", "rel_b"]           # heterogeneous graph with 2 relation types
    R, N, E = len(rel_names), 64, 16         # small synthetic graph
    IN_FEAT = 512

    root = jax.random.PRNGKey(0)
    k_adj, k_x, k_pos, k_neg, k_params = jax.random.split(root, 5)

    a_norm = build_norm_adjacency(k_adj, R, N)                          # [R, N, N]
    x = jax.random.normal(k_x, (N, IN_FEAT), jnp.float32)               # [N, 512]
    pos_edges = jax.random.randint(k_pos, (E, 2), 0, N, jnp.int32)      # pos_graph edges
    neg_edges = jax.random.randint(k_neg, (E, 2), 0, N, jnp.int32)      # neg_graph edges
    raw_params = init_params(k_params, rel_names)

    params = prepare_params(raw_params, R)                              # one-time packing
    graph = prepare_graph(a_norm, pos_edges, neg_edges)                 # one-time packing

    fwd = jax.jit(double_gcn_forward, static_argnames=("n_pos", "n_neg"))
    pos_score, neg_score = fwd(graph, params, x, n_pos=E, n_neg=E)
    jax.block_until_ready((pos_score, neg_score))

    ref_pos, ref_neg = reference_forward(raw_params, a_norm, pos_edges, neg_edges, x)
    assert pos_score.shape == (E,) and neg_score.shape == (E,)
    assert jnp.all(jnp.isfinite(pos_score)) and jnp.all(jnp.isfinite(neg_score))
    err = float(jnp.maximum(jnp.max(jnp.abs(pos_score - ref_pos)),
                            jnp.max(jnp.abs(neg_score - ref_neg))))
    assert err < 3e-2, f"max abs err vs reference: {err}"
    print("KERNEL_OK")
</pallas_src>

<mosaic_0001>
module attributes {stable_mosaic.version = 11 : i64} {
  func.func @_double_gcn_kernel(%arg0: memref<64x128xbf16, #tpu.memory_space<vmem>>, %arg1: memref<64x512xbf16, #tpu.memory_space<vmem>>, %arg2: memref<512x512xbf16, #tpu.memory_space<vmem>>, %arg3: memref<256x128xbf16, #tpu.memory_space<vmem>>, %arg4: memref<256x64xbf16, #tpu.memory_space<vmem>>, %arg5: memref<128x64xbf16, #tpu.memory_space<vmem>>, %arg6: memref<64x1xf32, #tpu.memory_space<vmem>>, %arg7: memref<4x256xf32, #tpu.memory_space<vmem>>, %arg8: memref<1x128xf32, #tpu.memory_space<vmem>>) attributes {dimension_semantics = [], scalar_prefetch = 0 : i64, scratch_operands = 0 : i64, tpu.core_type = #tpu.core_type<tc>} {
    %c0 = arith.constant 0 : index
    %c0_0 = arith.constant 0 : index
    %0 = vector.load %arg7[%c0, %c0_0] : memref<4x256xf32, #tpu.memory_space<vmem>>, vector<4x256xf32>
    %1 = vector.extract_strided_slice %0 {offsets = [0, 0], sizes = [1, 256], strides = [1, 1]} : vector<4x256xf32> to vector<1x256xf32>
    %2 = vector.extract_strided_slice %0 {offsets = [1, 0], sizes = [1, 64], strides = [1, 1]} : vector<4x256xf32> to vector<1x64xf32>
    %3 = vector.extract_strided_slice %0 {offsets = [2, 0], sizes = [1, 64], strides = [1, 1]} : vector<4x256xf32> to vector<1x64xf32>
    %4 = vector.extract_strided_slice %0 {offsets = [3, 0], sizes = [1, 1], strides = [1, 1]} : vector<4x256xf32> to vector<1x1xf32>
    %c0_1 = arith.constant 0 : index
    %c0_2 = arith.constant 0 : index
    %5 = vector.load %arg1[%c0_1, %c0_2] : memref<64x512xbf16, #tpu.memory_space<vmem>>, vector<64x512xbf16>
    %c0_3 = arith.constant 0 : index
    %c0_4 = arith.constant 0 : index
    %6 = vector.load %arg2[%c0_3, %c0_4] : memref<512x512xbf16, #tpu.memory_space<vmem>>, vector<512x512xbf16>
    %cst = arith.constant dense<0.000000e+00> : vector<64x512xf32>
    %7 = tpu.matmul %5, %6, %cst {dimension_numbers = #tpu.dot_dimension_numbers<[1], [0], [0], [1], [0, 0, 1, 1], [], []>} : vector<64x512xbf16>, vector<512x512xbf16>, vector<64x512xf32> -> vector<64x512xf32>
    %8 = vector.extract_strided_slice %7 {offsets = [0, 0], sizes = [64, 256], strides = [1, 1]} : vector<64x512xf32> to vector<64x256xf32>
    %9 = vector.extract_strided_slice %7 {offsets = [0, 256], sizes = [64, 256], strides = [1, 1]} : vector<64x512xf32> to vector<64x256xf32>
    %10 = tpu.concatenate %8, %9 in 0 : vector<64x256xf32>, vector<64x256xf32> -> vector<128x256xf32>
    %11 = arith.truncf %10 : vector<128x256xf32> to vector<128x256xbf16>
    %c0_5 = arith.constant 0 : index
    %c0_6 = arith.constant 0 : index
    %12 = vector.load %arg0[%c0_5, %c0_6] : memref<64x128xbf16, #tpu.memory_space<vmem>>, vector<64x128xbf16>
    %cst_7 = arith.constant dense<0.000000e+00> : vector<64x256xf32>
    %13 = tpu.matmul %12, %11, %cst_7 {dimension_numbers = #tpu.dot_dimension_numbers<[1], [0], [0], [1], [0, 0, 1, 1], [], []>} : vector<64x128xbf16>, vector<128x256xbf16>, vector<64x256xf32> -> vector<64x256xf32>
    %14 = vector.broadcast %1 : vector<1x256xf32> to vector<64x256xf32>
    %15 = arith.addf %13, %14 : vector<64x256xf32>
    %cst_8 = arith.constant 0.000000e+00 : f32
    %16 = vector.broadcast %cst_8 : f32 to vector<64x256xf32>
    %17 = arith.maximumf %15, %16 : vector<64x256xf32>
    %18 = arith.truncf %17 : vector<64x256xf32> to vector<64x256xbf16>
    %c0_9 = arith.constant 0 : index
    %c0_10 = arith.constant 0 : index
    %19 = vector.load %arg3[%c0_9, %c0_10] : memref<256x128xbf16, #tpu.memory_space<vmem>>, vector<256x128xbf16>
    %cst_11 = arith.constant dense<0.000000e+00> : vector<64x128xf32>
    %20 = tpu.matmul %18, %19, %cst_11 {dimension_numbers = #tpu.dot_dimension_numbers<[1], [0], [0], [1], [0, 0, 1, 1], [], []>} : vector<64x256xbf16>, vector<256x128xbf16>, vector<64x128xf32> -> vector<64x128xf32>
    %21 = vector.extract_strided_slice %20 {offsets = [0, 0], sizes = [64, 64], strides = [1, 1]} : vector<64x128xf32> to vector<64x64xf32>
    %22 = vector.extract_strided_slice %20 {offsets = [0, 64], sizes = [64, 64], strides = [1, 1]} : vector<64x128xf32> to vector<64x64xf32>
    %23 = tpu.concatenate %21, %22 in 0 : vector<64x64xf32>, vector<64x64xf32> -> vector<128x64xf32>
    %24 = arith.truncf %23 : vector<128x64xf32> to vector<128x64xbf16>
    %c0_12 = arith.constant 0 : index
    %c0_13 = arith.constant 0 : index
    %25 = vector.load %arg0[%c0_12, %c0_13] : memref<64x128xbf16, #tpu.memory_space<vmem>>, vector<64x128xbf16>
    %cst_14 = arith.constant dense<0.000000e+00> : vector<64x64xf32>
    %26 = tpu.matmul %25, %24, %cst_14 {dimension_numbers = #tpu.dot_dimension_numbers<[1], [0], [0], [1], [0, 0, 1, 1], [], []>} : vector<64x128xbf16>, vector<128x64xbf16>, vector<64x64xf32> -> vector<64x64xf32>
    %27 = vector.broadcast %2 : vector<1x64xf32> to vector<64x64xf32>
    %28 = arith.addf %26, %27 : vector<64x64xf32>
    %29 = arith.truncf %28 : vector<64x64xf32> to vector<64x64xbf16>
    %c0_15 = arith.constant 0 : index
    %c0_16 = arith.constant 0 : index
    %30 = vector.load %arg4[%c0_15, %c0_16] : memref<256x64xbf16, #tpu.memory_space<vmem>>, vector<256x64xbf16>
    %cst_17 = arith.constant dense<0.000000e+00> : vector<256x64xf32>
    %31 = tpu.matmul %30, %29, %cst_17 {dimension_numbers = #tpu.dot_dimension_numbers<[1], [0], [0], [1], [0, 0, 1, 1], [], []>} : vector<256x64xbf16>, vector<64x64xbf16>, vector<256x64xf32> -> vector<256x64xf32>
    %32 = vector.extract_strided_slice %31 {offsets = [0, 0], sizes = [128, 64], strides = [1, 1]} : vector<256x64xf32> to vector<128x64xf32>
    %33 = vector.extract_strided_slice %31 {offsets = [128, 0], sizes = [128, 64], strides = [1, 1]} : vector<256x64xf32> to vector<128x64xf32>
    %34 = tpu.concatenate %32, %33 in 1 : vector<128x64xf32>, vector<128x64xf32> -> vector<128x128xf32>
    %35 = arith.truncf %34 : vector<128x128xf32> to vector<128x128xbf16>
    %c0_18 = arith.constant 0 : index
    %c0_19 = arith.constant 0 : index
    %36 = vector.load %arg5[%c0_18, %c0_19] : memref<128x64xbf16, #tpu.memory_space<vmem>>, vector<128x64xbf16>
    %cst_20 = arith.constant dense<0.000000e+00> : vector<128x64xf32>
    %37 = tpu.matmul %35, %36, %cst_20 {dimension_numbers = #tpu.dot_dimension_numbers<[1], [0], [0], [1], [0, 0, 1, 1], [], []>} : vector<128x128xbf16>, vector<128x64xbf16>, vector<128x64xf32> -> vector<128x64xf32>
    %38 = vector.broadcast %3 : vector<1x64xf32> to vector<128x64xf32>
    %39 = arith.addf %37, %38 : vector<128x64xf32>
    %cst_21 = arith.constant 0.000000e+00 : f32
    %40 = vector.broadcast %cst_21 : f32 to vector<128x64xf32>
    %41 = arith.maximumf %39, %40 : vector<128x64xf32>
    %42 = tpu.transpose %41, [1, 0] : vector<128x64xf32> -> vector<64x128xf32>
    %c0_22 = arith.constant 0 : index
    %c0_23 = arith.constant 0 : index
    %43 = vector.load %arg6[%c0_22, %c0_23] : memref<64x1xf32, #tpu.memory_space<vmem>>, vector<64x1xf32>
    %44 = vector.broadcast %43 : vector<64x1xf32> to vector<64x128xf32>
    %45 = arith.mulf %42, %44 : vector<64x128xf32>
    %cst_24 = arith.constant dense<0.000000e+00> : vector<128xf32>
    %46 = vector.multi_reduction <add>, %45, %cst_24 [0] : vector<64x128xf32> to vector<128xf32>
    %47 = vector.shape_cast %46 : vector<128xf32> to vector<1x128xf32>
    %48 = vector.broadcast %4 : vector<1x1xf32> to vector<1x128xf32>
    %49 = arith.addf %47, %48 : vector<1x128xf32>
    %c0_25 = arith.constant 0 : index
    %c0_26 = arith.constant 0 : index
    %50 = vector.load %arg8[%c0_25, %c0_26] : memref<1x128xf32, #tpu.memory_space<vmem>>, vector<1x128xf32>
    tpu.vector_store %arg8[%c0_25, %c0_26], %49 {strides = array<i32>} : memref<1x128xf32, #tpu.memory_space<vmem>>, vector<1x128xf32>,
    return
  }
}

</mosaic_0001>

<bundles_post_ra>
// kernel: double_gcn_forward.1
= control target key start
LH: loop header
LB: loop body
LE: loop exit
PB: predicated region body
PF: predicated region fallthrough
CT: control target
= control target key end

     0   :  { %13 = vsyncpa [#allocation3], 0  ;;  %s3159_s27 = smov [#allocation2]   ;;  %s3554_s0 = inlined_call_operand.vmem [shape: bf16[64,128], index: 0, kind: input, shape index: {}]   ;;  %s3555_s1 = inlined_call_operand.vmem [shape: bf16[64,512], index: 1, kind: input, shape index: {}]   ;;  %s3556_s2 = inlined_call_operand.hbm [shape: bf16[512,512], index: 2, kind: input, shape index: {}]   ;;  %s3557_s3 = inlined_call_operand.vmem [shape: bf16[256,128], index: 3, kind: input, shape index: {}]   ;;  %s3558_s4 = inlined_call_operand.vmem [shape: bf16[256,64], index: 4, kind: input, shape index: {}]   ;;  %s3559_s5 = inlined_call_operand.vmem [shape: bf16[128,64], index: 5, kind: input, shape index: {}]   ;;  %s3560_s6 = inlined_call_operand.vmem [shape: f32[64,1], index: 6, kind: input, shape index: {}]   ;;  %s3561_s7 = inlined_call_operand.vmem [shape: f32[4,256], index: 7, kind: input, shape index: {}]   ;;  %s3562_s8 = inlined_call_operand.vmem [shape: f32[1,128], index: 8, kind: output, shape index: {}]  }
   0x1   :  { %s23_s28 = sshll.u32 %s3159_s27, 4  ;;  %s3135_s9 = scalar_lea.hbm %s3556_s2, 16384  ;;  %s24_s28 = int_to_ptr.vmem [resolvable:$true] %s23_s28 }
   0x2   :  { %p3136_p0 = scmp.ne.s32.totalorder %s3556_s2, %s3135_s9  ;;  %p3139_p1 = scmp.lt.u32.totalorder %s3135_s9, %s3556_s2 }
   0x4   :  { %p3141_p2 = pnand %p3139_p1, %p3136_p0 }
   0x6   :  { %3144 = shalt.err (!%p3141_p2)
}
   0x7   :  { %s3145_s14 = scalar_lea.vmem %s24_s28, 16384  ;;  %p3150_p4 = scmp.lt.s32.totalorder %s24_s28, %s24_s28 }
   0x8   :  { %p3146_p3 = scmp.ne.s32.totalorder %s24_s28, %s3145_s14  ;;  %p3151_p5 = scmp.lt.s32.totalorder %s3145_s14, %s3145_s14 }
   0xa   :  { %p3152_p6 = por %p3151_p5, %p3150_p4 }
   0xc   :  { %p3153_p7 = pnand %p3152_p6, %p3146_p3 }
   0xe   :  { %3156 = shalt.err (!%p3153_p7)
}
   0xf   :  { %s3160_s15 = smov 256   ;;  %s3161_s16 = smov 16  }
  0x10   :  { %29 = dma.hbm_to_vmem [thread:$0]  %s3556_s2, 16384, %s24_s28, [#allocation3], %s3160_s15, %s3160_s15, %s3161_s16  }
  0x11   :  { %3157 = dma.done.wait [#allocation3], 16384  }
  0x12   :  { %3158 = vsyncadd [#allocation3], 4294950912  ;;  %v2875_v0 = vld [vmem:[#allocation2 + $0x4] ss:$16 sps:$4 sm:$0xff]   ;;  %v2877_v1 = vld [vmem:[#allocation2 + $0xc] ss:$16 sps:$4 sm:$0xff]  }
  0x13   :  { %909 = vmatprep.subr.bf16.mxu0 %v2875_v0  ;;  %v2879_v2 = vld [vmem:[#allocation2] ss:$16 sps:$4 sm:$0xff]   ;;  %v2880_v3 = vld [vmem:[#allocation2 + $0x8] ss:$16 sps:$4 sm:$0xff]   ;;  %1055 = vmatprep.subr.bf16.mxu1 %v2877_v1  ;;  %v2881_v4 = vld [vmem:[#allocation2 + $0x24] ss:$16 sps:$4 sm:$0xff]  }
  0x14   :  { %910 = vmatpush1.bf16.msra.mxu0 %v2879_v2  ;;  %1056 = vmatpush1.bf16.msra.mxu1 %v2880_v3  ;;  %v2883_v5 = vld [vmem:[#allocation2 + $0x2c] ss:$16 sps:$4 sm:$0xff]   ;;  %v2885_v6 = vld [vmem:[#allocation2 + $0x20] ss:$16 sps:$4 sm:$0xff]   ;;  %v2886_v7 = vld [vmem:[#allocation2 + $0x28] ss:$16 sps:$4 sm:$0xff]  }
  0x15   :  { %911 = vmatprep.subr.bf16.mxu0 %v2881_v4  ;;  %1057 = vmatprep.subr.bf16.mxu1 %v2883_v5  ;;  %v2887_v8 = vld [vmem:[#allocation2 + $0x44] ss:$16 sps:$4 sm:$0xff]   ;;  %v2889_v9 = vld [vmem:[#allocation2 + $0x4c] ss:$16 sps:$4 sm:$0xff]   ;;  %v2891_v10 = vld [vmem:[#allocation2 + $0x40] ss:$16 sps:$4 sm:$0xff]  }
  0x16   :  { %v2892_v11 = vld [vmem:[#allocation2 + $0x48] ss:$16 sps:$4 sm:$0xff]   ;;  %v2893_v12 = vld [vmem:[#allocation2 + $0x64] ss:$16 sps:$4 sm:$0xff]   ;;  %v2895_v13 = vld [vmem:[#allocation2 + $0x6c] ss:$16 sps:$4 sm:$0xff]  }
  0x17   :  { %v2897_v14 = vld [vmem:[#allocation2 + $0x60] ss:$16 sps:$4 sm:$0xff]   ;;  %v2898_v15 = vld [vmem:[#allocation2 + $0x68] ss:$16 sps:$4 sm:$0xff]   ;;  %v2899_v16 = vld [vmem:[#allocation2 + $0x84] ss:$16 sps:$4 sm:$0xff]  }
  0x18   :  { %912 = vmatpush1.bf16.msra.mxu0 %v2885_v6  ;;  %1058 = vmatpush1.bf16.msra.mxu1 %v2886_v7  ;;  %v2901_v17 = vld [vmem:[#allocation2 + $0x8c] ss:$16 sps:$4 sm:$0xff]   ;;  %v2903_v18 = vld [vmem:[#allocation2 + $0x80] ss:$16 sps:$4 sm:$0xff]   ;;  %v2904_v19 = vld [vmem:[#allocation2 + $0x88] ss:$16 sps:$4 sm:$0xff]  }
  0x19   :  { %913 = vmatprep.subr.bf16.mxu0 %v2887_v8  ;;  %1059 = vmatprep.subr.bf16.mxu1 %v2889_v9  ;;  %v2905_v20 = vld [vmem:[#allocation2 + $0xa4] ss:$16 sps:$4 sm:$0xff]   ;;  %v2907_v21 = vld [vmem:[#allocation2 + $0xac] ss:$16 sps:$4 sm:$0xff]   ;;  %v2909_v22 = vld [vmem:[#allocation2 + $0xa0] ss:$16 sps:$4 sm:$0xff]  }
  0x1a   :  { %v2910_v23 = vld [vmem:[#allocation2 + $0xa8] ss:$16 sps:$4 sm:$0xff]   ;;  %v2911_v24 = vld [vmem:[#allocation2 + $0xc4] ss:$16 sps:$4 sm:$0xff]   ;;  %v2913_v25 = vld [vmem:[#allocation2 + $0xcc] ss:$16 sps:$4 sm:$0xff]  }
  0x1b   :  { %v2915_v26 = vld [vmem:[#allocation2 + $0xc0] ss:$16 sps:$4 sm:$0xff]   ;;  %v2916_v27 = vld [vmem:[#allocation2 + $0xc8] ss:$16 sps:$4 sm:$0xff]   ;;  %v2917_v28 = vld [vmem:[#allocation2 + $0xe4] ss:$16 sps:$4 sm:$0xff]  }
  0x1c   :  { %914 = vmatpush1.bf16.msra.mxu0 %v2891_v10  ;;  %1060 = vmatpush1.bf16.msra.mxu1 %v2892_v11  ;;  %v2919_v29 = vld [vmem:[#allocation2 + $0xec] ss:$16 sps:$4 sm:$0xff]   ;;  %v2921_v30 = vld [vmem:[#allocation2 + $0xe0] ss:$16 sps:$4 sm:$0xff]   ;;  %v2922_v31 = vld [vmem:[#allocation2 + $0xe8] ss:$16 sps:$4 sm:$0xff]  }
  0x1d   :  { %915 = vmatprep.subr.bf16.mxu0 %v2893_v12  ;;  %1061 = vmatprep.subr.bf16.mxu1 %v2895_v13  ;;  %v2923_v32 = vld [vmem:[#allocation2 + $0x104] ss:$16 sps:$4 sm:$0xff]   ;;  %v2925_v33 = vld [vmem:[#allocation2 + $0x10c] ss:$16 sps:$4 sm:$0xff]   ;;  %v2927_v34 = vld [vmem:[#allocation2 + $0x100] ss:$16 sps:$4 sm:$0xff]  }
  0x1e   :  { %v2928_v35 = vld [vmem:[#allocation2 + $0x108] ss:$16 sps:$4 sm:$0xff]   ;;  %v2929_v36 = vld [vmem:[#allocation2 + $0x124] ss:$16 sps:$4 sm:$0xff]   ;;  %v2931_v37 = vld [vmem:[#allocation2 + $0x12c] ss:$16 sps:$4 sm:$0xff]  }
  0x1f   :  { %v2933_v38 = vld [vmem:[#allocation2 + $0x120] ss:$16 sps:$4 sm:$0xff]   ;;  %v2934_v39 = vld [vmem:[#allocation2 + $0x128] ss:$16 sps:$4 sm:$0xff]   ;;  %v2935_v40 = vld [vmem:[#allocation2 + $0x144] ss:$16 sps:$4 sm:$0xff]  }
  0x20   :  { %916 = vmatpush1.bf16.msra.mxu0 %v2897_v14  ;;  %1062 = vmatpush1.bf16.msra.mxu1 %v2898_v15  ;;  %v2937_v41 = vld [vmem:[#allocation2 + $0x14c] ss:$16 sps:$4 sm:$0xff]   ;;  %v2939_v42 = vld [vmem:[#allocation2 + $0x140] ss:$16 sps:$4 sm:$0xff]   ;;  %v2940_v43 = vld [vmem:[#allocation2 + $0x148] ss:$16 sps:$4 sm:$0xff]  }
  0x21   :  { %917 = vmatprep.subr.bf16.mxu0 %v2899_v16  ;;  %1063 = vmatprep.subr.bf16.mxu1 %v2901_v17  ;;  %v2941_v44 = vld [vmem:[#allocation2 + $0x164] ss:$16 sps:$4 sm:$0xff]   ;;  %v2943_v45 = vld [vmem:[#allocation2 + $0x16c] ss:$16 sps:$4 sm:$0xff]   ;;  %v2945_v46 = vld [vmem:[#allocation2 + $0x160] ss:$16 sps:$4 sm:$0xff]  }
  0x22   :  { %v2946_v47 = vld [vmem:[#allocation2 + $0x168] ss:$16 sps:$4 sm:$0xff]   ;;  %v2973_v48 = vld [vmem:[%s3555_s1 + $0x4] ss:$16 sps:$4 sm:$0xff]   ;;  %v2949_v50 = vld [vmem:[#allocation2 + $0x18c] ss:$16 sps:$4 sm:$0xff]  }
  0x23   :  { %v2947_v49 = vld [vmem:[#allocation2 + $0x184] ss:$16 sps:$4 sm:$0xff]   ;;  %941 = vmatprep.mubr.bf16.mxu0 %v2973_v48  ;;  %1087 = vmatprep.mubr.bf16.mxu1 %v2973_v48  ;;  %v2951_v51 = vld [vmem:[#allocation2 + $0x180] ss:$16 sps:$4 sm:$0xff]   ;;  %v2952_v52 = vld [vmem:[#allocation2 + $0x188] ss:$16 sps:$4 sm:$0xff]  }
  0x24   :  { %918 = vmatpush1.bf16.msra.mxu0 %v2903_v18  ;;  %1064 = vmatpush1.bf16.msra.mxu1 %v2904_v19  ;;  %v2953_v53 = vld [vmem:[#allocation2 + $0x1a4] ss:$16 sps:$4 sm:$0xff]   ;;  %v2955_v54 = vld [vmem:[#allocation2 + $0x1ac] ss:$16 sps:$4 sm:$0xff]   ;;  %v2957_v55 = vld [vmem:[#allocation2 + $0x1a0] ss:$16 sps:$4 sm:$0xff]  }
  0x25   :  { %919 = vmatprep.subr.bf16.mxu0 %v2905_v20  ;;  %1065 = vmatprep.subr.bf16.mxu1 %v2907_v21  ;;  %v2958_v56 = vld [vmem:[#allocation2 + $0x1a8] ss:$16 sps:$4 sm:$0xff]   ;;  %v2959_v57 = vld [vmem:[#allocation2 + $0x1c4] ss:$16 sps:$4 sm:$0xff]   ;;  %v2961_v58 = vld [vmem:[#allocation2 + $0x1cc] ss:$16 sps:$4 sm:$0xff]  }
  0x26   :  { %v2963_v59 = vld [vmem:[#allocation2 + $0x1c0] ss:$16 sps:$4 sm:$0xff]   ;;  %v2964_v60 = vld [vmem:[#allocation2 + $0x1c8] ss:$16 sps:$4 sm:$0xff]   ;;  %v2965_v61 = vld [vmem:[#allocation2 + $0x1e4] ss:$16 sps:$4 sm:$0xff]  }
  0x27   :  { %v2967_v62 = vld [vmem:[#allocation2 + $0x1ec] ss:$16 sps:$4 sm:$0xff]   ;;  %v2969_v63 = vld [vmem:[#allocation2 + $0x1e0] ss:$16 sps:$4 sm:$0xff]   ;;  %v2970_v0 = vld [vmem:[#allocation2 + $0x1e8] ss:$16 sps:$4 sm:$0xff]  }
  0x28   :  { %920 = vmatpush1.bf16.msra.mxu0 %v2909_v22  ;;  %1066 = vmatpush1.bf16.msra.mxu1 %v2910_v23  ;;  %v2976_v1 = vld [vmem:[#allocation2 + $0x204] ss:$16 sps:$4 sm:$0xff]   ;;  %v2979_v2 = vld [vmem:[#allocation2 + $0x20c] ss:$16 sps:$4 sm:$0xff]   ;;  %v2971_v3 = vld [vmem:[%s3555_s1] ss:$16 sps:$4 sm:$0xff]  }
  0x29   :  { %921 = vmatprep.subr.bf16.mxu0 %v2911_v24  ;;  %1067 = vmatprep.subr.bf16.mxu1 %v2913_v25  ;;  %v2974_v4 = vld [vmem:[#allocation2 + $0x200] ss:$16 sps:$4 sm:$0xff]   ;;  %v2977_v5 = vld [vmem:[#allocation2 + $0x208] ss:$16 sps:$4 sm:$0xff]   ;;  %v2982_v6 = vld [vmem:[#allocation2 + $0x224] ss:$16 sps:$4 sm:$0xff]  }
  0x2a   :  { %v2985_v7 = vld [vmem:[#allocation2 + $0x22c] ss:$16 sps:$4 sm:$0xff]   ;;  %v2980_v8 = vld [vmem:[#allocation2 + $0x220] ss:$16 sps:$4 sm:$0xff]   ;;  %v2983_v9 = vld [vmem:[#allocation2 + $0x228] ss:$16 sps:$4 sm:$0xff]  }
  0x2b   :  { %v2988_v10 = vld [vmem:[#allocation2 + $0x244] ss:$16 sps:$4 sm:$0xff]   ;;  %v2991_v11 = vld [vmem:[#allocation2 + $0x24c] ss:$16 sps:$4 sm:$0xff]   ;;  %v2986_v12 = vld [vmem:[#allocation2 + $0x240] ss:$16 sps:$4 sm:$0xff]  }
  0x2c   :  { %922 = vmatpush1.bf16.msra.mxu0 %v2915_v26  ;;  %1068 = vmatpush1.bf16.msra.mxu1 %v2916_v27  ;;  %v2989_v13 = vld [vmem:[#allocation2 + $0x248] ss:$16 sps:$4 sm:$0xff]   ;;  %v3034_v14 = vld [vmem:[%s3555_s1 + $0x24] ss:$16 sps:$4 sm:$0xff]   ;;  %v3036_v15 = vld [vmem:[%s3555_s1 + $0x20] ss:$16 sps:$4 sm:$0xff]  }
  0x2d   :  { %923 = vmatprep.subr.bf16.mxu0 %v2917_v28  ;;  %1069 = vmatprep.subr.bf16.mxu1 %v2919_v29  ;;  %v2994_v16 = vld [vmem:[#allocation2 + $0x264] ss:$16 sps:$4 sm:$0xff]   ;;  %v2997_v17 = vld [vmem:[#allocation2 + $0x26c] ss:$16 sps:$4 sm:$0xff]   ;;  %v2992_v18 = vld [vmem:[#allocation2 + $0x260] ss:$16 sps:$4 sm:$0xff]  }
  0x2e   :  { %v2995_v19 = vld [vmem:[#allocation2 + $0x268] ss:$16 sps:$4 sm:$0xff]   ;;  %v3000_v20 = vld [vmem:[#allocation2 + $0x284] ss:$16 sps:$4 sm:$0xff]   ;;  %v3003_v21 = vld [vmem:[#allocation2 + $0x28c] ss:$16 sps:$4 sm:$0xff]  }
  0x2f   :  { %v2998_v22 = vld [vmem:[#allocation2 + $0x280] ss:$16 sps:$4 sm:$0xff]   ;;  %v3049_v23 = vld [vmem:[%s3555_s1 + $0x44] ss:$16 sps:$4 sm:$0xff]   ;;  %v3001_v24 = vld [vmem:[#allocation2 + $0x288] ss:$16 sps:$4 sm:$0xff]  }
  0x30   :  { %924 = vmatpush1.bf16.msra.mxu0 %v2921_v30  ;;  %1070 = vmatpush1.bf16.msra.mxu1 %v2922_v31  ;;  %v3051_v25 = vld [vmem:[%s3555_s1 + $0x40] ss:$16 sps:$4 sm:$0xff]   ;;  %v3006_v26 = vld [vmem:[#allocation2 + $0x2a4] ss:$16 sps:$4 sm:$0xff]   ;;  %v3009_v27 = vld [vmem:[#allocation2 + $0x2ac] ss:$16 sps:$4 sm:$0xff]  }
  0x31   :  { %925 = vmatprep.subr.bf16.mxu0 %v2923_v32  ;;  %1071 = vmatprep.subr.bf16.mxu1 %v2925_v33  ;;  %v3004_v28 = vld [vmem:[#allocation2 + $0x2a0] ss:$16 sps:$4 sm:$0xff]   ;;  %v3007_v29 = vld [vmem:[#allocation2 + $0x2a8] ss:$16 sps:$4 sm:$0xff]   ;;  %v3012_v30 = vld [vmem:[#allocation2 + $0x2c4] ss:$16 sps:$4 sm:$0xff]  }
  0x32   :  { %v3064_v31 = vld [vmem:[%s3555_s1 + $0x64] ss:$16 sps:$4 sm:$0xff]   ;;  %v3015_v32 = vld [vmem:[#allocation2 + $0x2cc] ss:$16 sps:$4 sm:$0xff]   ;;  %v3010_v33 = vld [vmem:[#allocation2 + $0x2c0] ss:$16 sps:$4 sm:$0xff]  }
  0x33   :  { %v3031_v48 = vld [vmem:[#allocation2 + $0x328] ss:$16 sps:$4 sm:$0xff]   ;;  %vm1783_vm0 = vcmask 523264  }
  0x34   :  { %926 = vmatpush1.bf16.msra.mxu0 %v2927_v34  ;;  %1072 = vmatpush1.bf16.msra.mxu1 %v2928_v35  ;;  %v3013_v34 = vld [vmem:[#allocation2 + $0x2c8] ss:$16 sps:$4 sm:$0xff]   ;;  %v3066_v35 = vld [vmem:[%s3555_s1 + $0x60] ss:$16 sps:$4 sm:$0xff]  }
  0x35   :  { %927 = vmatprep.subr.bf16.mxu0 %v2929_v36  ;;  %1073 = vmatprep.subr.bf16.mxu1 %v2931_v37  ;;  %v3018_v36 = vld [vmem:[#allocation2 + $0x2e4] ss:$16 sps:$4 sm:$0xff]   ;;  %v3021_v37 = vld [vmem:[#allocation2 + $0x2ec] ss:$16 sps:$4 sm:$0xff]  }
  0x38   :  { %928 = vmatpush1.bf16.msra.mxu0 %v2933_v38  ;;  %1074 = vmatpush1.bf16.msra.mxu1 %v2934_v39  ;;  %v3016_v38 = vld [vmem:[#allocation2 + $0x2e0] ss:$16 sps:$4 sm:$0xff]   ;;  %v3019_v39 = vld [vmem:[#allocation2 + $0x2e8] ss:$16 sps:$4 sm:$0xff]  }
  0x39   :  { %929 = vmatprep.subr.bf16.mxu0 %v2935_v40  ;;  %1075 = vmatprep.subr.bf16.mxu1 %v2937_v41  ;;  %v3081_v40 = vld [vmem:[%s3555_s1 + $0xc] ss:$16 sps:$4 sm:$0xff]   ;;  %v3024_v41 = vld [vmem:[#allocation2 + $0x304] ss:$16 sps:$4 sm:$0xff]  }
  0x3c   :  { %930 = vmatpush1.bf16.msra.mxu0 %v2939_v42  ;;  %1076 = vmatpush1.bf16.msra.mxu1 %v2940_v43  ;;  %v3027_v42 = vld [vmem:[#allocation2 + $0x30c] ss:$16 sps:$4 sm:$0xff]   ;;  %v3022_v43 = vld [vmem:[#allocation2 + $0x300] ss:$16 sps:$4 sm:$0xff]  }
  0x3d   :  { %931 = vmatprep.subr.bf16.mxu0 %v2941_v44  ;;  %1077 = vmatprep.subr.bf16.mxu1 %v2943_v45  ;;  %v3025_v44 = vld [vmem:[#allocation2 + $0x308] ss:$16 sps:$4 sm:$0xff]   ;;  %v3030_v45 = vld [vmem:[#allocation2 + $0x324] ss:$16 sps:$4 sm:$0xff]  }
  0x40   :  { %932 = vmatpush1.bf16.msra.mxu0 %v2945_v46  ;;  %1078 = vmatpush1.bf16.msra.mxu1 %v2946_v47  ;;  %v3033_v46 = vld [vmem:[#allocation2 + $0x32c] ss:$16 sps:$4 sm:$0xff]   ;;  %v3028_v47 = vld [vmem:[#allocation2 + $0x320] ss:$16 sps:$4 sm:$0xff]  }
  0x41   :  { %933 = vmatprep.subr.bf16.mxu0 %v2947_v49  ;;  %1079 = vmatprep.subr.bf16.mxu1 %v2949_v50  ;;  %v3039_v49 = vld [vmem:[#allocation2 + $0x344] ss:$16 sps:$4 sm:$0xff]   ;;  %v3042_v50 = vld [vmem:[#allocation2 + $0x34c] ss:$16 sps:$4 sm:$0xff]  }
  0x44   :  { %934 = vmatpush1.bf16.msra.mxu0 %v2951_v51  ;;  %1080 = vmatpush1.bf16.msra.mxu1 %v2952_v52  ;;  %v3037_v51 = vld [vmem:[#allocation2 + $0x340] ss:$16 sps:$4 sm:$0xff]   ;;  %v3040_v52 = vld [vmem:[#allocation2 + $0x348] ss:$16 sps:$4 sm:$0xff]  }
  0x45   :  { %935 = vmatprep.subr.bf16.mxu0 %v2953_v53  ;;  %1081 = vmatprep.subr.bf16.mxu1 %v2955_v54  ;;  %v3045_v53 = vld [vmem:[#allocation2 + $0x364] ss:$16 sps:$4 sm:$0xff]   ;;  %v3048_v54 = vld [vmem:[#allocation2 + $0x36c] ss:$16 sps:$4 sm:$0xff]  }
  0x48   :  { %936 = vmatpush1.bf16.msra.mxu0 %v2957_v55  ;;  %1082 = vmatpush1.bf16.msra.mxu1 %v2958_v56  ;;  %v3043_v55 = vld [vmem:[#allocation2 + $0x360] ss:$16 sps:$4 sm:$0xff]   ;;  %v3046_v56 = vld [vmem:[#allocation2 + $0x368] ss:$16 sps:$4 sm:$0xff]  }
  0x49   :  { %937 = vmatprep.subr.bf16.mxu0 %v2959_v57  ;;  %1083 = vmatprep.subr.bf16.mxu1 %v2961_v58  ;;  %v3054_v57 = vld [vmem:[#allocation2 + $0x384] ss:$16 sps:$4 sm:$0xff]   ;;  %v3057_v58 = vld [vmem:[#allocation2 + $0x38c] ss:$16 sps:$4 sm:$0xff]  }
  0x4c   :  { %938 = vmatpush1.bf16.msra.mxu0 %v2963_v59  ;;  %1084 = vmatpush1.bf16.msra.mxu1 %v2964_v60  ;;  %v3052_v59 = vld [vmem:[#allocation2 + $0x380] ss:$16 sps:$4 sm:$0xff]   ;;  %v3055_v60 = vld [vmem:[#allocation2 + $0x388] ss:$16 sps:$4 sm:$0xff]  }
  0x4d   :  { %939 = vmatprep.subr.bf16.mxu0 %v2965_v61  ;;  %1085 = vmatprep.subr.bf16.mxu1 %v2967_v62  ;;  %v3060_v61 = vld [vmem:[#allocation2 + $0x3a4] ss:$16 sps:$4 sm:$0xff]   ;;  %v3063_v62 = vld [vmem:[#allocation2 + $0x3ac] ss:$16 sps:$4 sm:$0xff]  }
  0x50   :  { %940 = vmatpush1.bf16.msra.mxu0 %v2969_v63  ;;  %1086 = vmatpush1.bf16.msra.mxu1 %v2970_v0  ;;  %v3058_v63 = vld [vmem:[#allocation2 + $0x3a0] ss:$16 sps:$4 sm:$0xff]   ;;  %v3061_v0 = vld [vmem:[#allocation2 + $0x3a8] ss:$16 sps:$4 sm:$0xff]  }
  0x51   :  { %982 = vmatprep.subr.bf16.mxu0 %v2976_v1  ;;  %1128 = vmatprep.subr.bf16.mxu1 %v2979_v2  ;;  %v3069_v1 = vld [vmem:[#allocation2 + $0x3c4] ss:$16 sps:$4 sm:$0xff]   ;;  %v3072_v2 = vld [vmem:[#allocation2 + $0x3cc] ss:$16 sps:$4 sm:$0xff]  }
  0x53   :  { %942 = vmatmul.mubr.bf16.vlgmr.msra.gmra.mrb[0].mxu0 %v2971_v3  ;;  %1088 = vmatmul.mubr.bf16.vlgmr.msra.gmra.mrb[0].mxu1 %v2971_v3  ;;  %v3067_v3 = vld [vmem:[#allocation2 + $0x3c0] ss:$16 sps:$4 sm:$0xff]  }
  0x54   :  { %983 = vmatpush1.bf16.msra.mxu0 %v2974_v4  ;;  %1129 = vmatpush1.bf16.msra.mxu1 %v2977_v5  ;;  %v3070_v4 = vld [vmem:[#allocation2 + $0x3c8] ss:$16 sps:$4 sm:$0xff]   ;;  %v3075_v5 = vld [vmem:[#allocation2 + $0x3e4] ss:$16 sps:$4 sm:$0xff]  }
  0x55   :  { %984 = vmatprep.subr.bf16.mxu0 %v2982_v6  ;;  %1130 = vmatprep.subr.bf16.mxu1 %v2985_v7  ;;  %v3078_v6 = vld [vmem:[#allocation2 + $0x3ec] ss:$16 sps:$4 sm:$0xff]   ;;  %v3073_v7 = vld [vmem:[#allocation2 + $0x3e0] ss:$16 sps:$4 sm:$0xff]  }
  0x56   :  { %951 = vmatprep.mubr.bf16.mxu0 %v3034_v14  ;;  %1097 = vmatprep.mubr.bf16.mxu1 %v3034_v14  ;;  %v3088_v14 = vld [vmem:[%s3555_s1 + $0x6c] ss:$16 sps:$4 sm:$0xff]  }
  0x58   :  { %985 = vmatpush1.bf16.msra.mxu0 %v2980_v8  ;;  %1131 = vmatpush1.bf16.msra.mxu1 %v2983_v9  ;;  %v3076_v8 = vld [vmem:[#allocation2 + $0x3e8] ss:$16 sps:$4 sm:$0xff]  }
  0x59   :  { %986 = vmatprep.subr.bf16.mxu0 %v2988_v10  ;;  %1132 = vmatprep.subr.bf16.mxu1 %v2991_v11  ;;  %v3079_v9 = vld [vmem:[%s3555_s1 + $0x8] ss:$16 sps:$4 sm:$0xff]   ;;  %v3082_v10 = vld [vmem:[%s3555_s1 + $0x2c] ss:$16 sps:$4 sm:$0xff]  }
  0x5a   :  { %v3084_v11 = vld [vmem:[%s3555_s1 + $0x28] ss:$16 sps:$4 sm:$0xff]  }
  0x5b   :  { %952 = vmatmul.mubr.bf16.gmra.mrb[4].mxu0 %v3036_v15  ;;  %1098 = vmatmul.mubr.bf16.gmra.mrb[4].mxu1 %v3036_v15  ;;  %v3090_v15 = vld [vmem:[%s3555_s1 + $0x68] ss:$16 sps:$4 sm:$0xff]  }
  0x5c   :  { %987 = vmatpush1.bf16.msra.mxu0 %v2986_v12  ;;  %1133 = vmatpush1.bf16.msra.mxu1 %v2989_v13  ;;  %v3085_v12 = vld [vmem:[%s3555_s1 + $0x4c] ss:$16 sps:$4 sm:$0xff]   ;;  %v3087_v13 = vld [vmem:[%s3555_s1 + $0x48] ss:$16 sps:$4 sm:$0xff]  }
  0x5d   :  { %988 = vmatprep.subr.bf16.mxu0 %v2994_v16  ;;  %1134 = vmatprep.subr.bf16.mxu1 %v2997_v17  ;;  %v3162_v16 = vmov 0   ;;  %v3095_v17 = vld [vmem:[%s3557_s3 + $0x40] sm:$0xff]  }
  0x5e   :  { %961 = vmatprep.mubr.bf16.mxu0 %v3049_v23  ;;  %1107 = vmatprep.mubr.bf16.mxu1 %v3049_v23  ;;  %v3101_v23 = vld [vmem:[%s3557_s3 + $0x58] sm:$0xff]  }
  0x5f   :  { %2873 = vset.pattern.permute.xlu1 %v3162_v16 }
  0x60   :  { %989 = vmatpush1.bf16.msra.mxu0 %v2992_v18  ;;  %1135 = vmatpush1.bf16.msra.mxu1 %v2995_v19  ;;  %v3096_v18 = vld [vmem:[%s3557_s3] sm:$0xff]   ;;  %v3097_v19 = vld [vmem:[%s3557_s3 + $0x48] sm:$0xff]  }
  0x61   :  { %990 = vmatprep.subr.bf16.mxu0 %v3000_v20  ;;  %1136 = vmatprep.subr.bf16.mxu1 %v3003_v21  ;;  %v3098_v20 = vld [vmem:[%s3557_s3 + $0x8] sm:$0xff]   ;;  %v3099_v21 = vld [vmem:[%s3557_s3 + $0x50] sm:$0xff]  }
  0x63   :  { %962 = vmatmul.mubr.bf16.gmra.mrb[8].mxu0 %v3051_v25  ;;  %1108 = vmatmul.mubr.bf16.gmra.mrb[8].mxu1 %v3051_v25  ;;  %v3103_v25 = vld [vmem:[%s3557_s3 + $0x60] sm:$0xff]  }
  0x64   :  { %991 = vmatpush1.bf16.msra.mxu0 %v2998_v22  ;;  %1137 = vmatpush1.bf16.msra.mxu1 %v3001_v24  ;;  %v3100_v22 = vld [vmem:[%s3557_s3 + $0x10] sm:$0xff]   ;;  %v3102_v24 = vld [vmem:[%s3557_s3 + $0x18] sm:$0xff]  }
  0x65   :  { %992 = vmatprep.subr.bf16.mxu0 %v3006_v26  ;;  %1138 = vmatprep.subr.bf16.mxu1 %v3009_v27  ;;  %v3104_v26 = vld [vmem:[%s3557_s3 + $0x20] sm:$0xff]   ;;  %v3105_v27 = vld [vmem:[%s3557_s3 + $0x68] sm:$0xff]  }
  0x66   :  { %971 = vmatprep.mubr.bf16.mxu0 %v3064_v31  ;;  %1117 = vmatprep.mubr.bf16.mxu1 %v3064_v31 }
  0x68   :  { %993 = vmatpush1.bf16.msra.mxu0 %v3004_v28  ;;  %1139 = vmatpush1.bf16.msra.mxu1 %v3007_v29 }
  0x69   :  { %994 = vmatprep.subr.bf16.mxu0 %v3012_v30  ;;  %1140 = vmatprep.subr.bf16.mxu1 %v3015_v32 }
  0x6b   :  { %972 = vmatmul.mubr.bf16.gmra.mrb[12].mxu0 %v3066_v35  ;;  %1118 = vmatmul.mubr.bf16.gmra.mrb[12].mxu1 %v3066_v35 }
  0x6c   :  { %995 = vmatpush1.bf16.msra.mxu0 %v3010_v33  ;;  %1141 = vmatpush1.bf16.msra.mxu1 %v3013_v34 }
  0x6d   :  { %996 = vmatprep.subr.bf16.mxu0 %v3018_v36  ;;  %1142 = vmatprep.subr.bf16.mxu1 %v3021_v37 }
  0x6e   :  { %1014 = vmatprep.mubr.bf16.mxu0 %v3081_v40  ;;  %1160 = vmatprep.mubr.bf16.mxu1 %v3081_v40 }
  0x70   :  { %997 = vmatpush1.bf16.msra.mxu0 %v3016_v38  ;;  %1143 = vmatpush1.bf16.msra.mxu1 %v3019_v39 }
  0x71   :  { %998 = vmatprep.subr.bf16.mxu0 %v3024_v41  ;;  %1144 = vmatprep.subr.bf16.mxu1 %v3027_v42 }
  0x74   :  { %999 = vmatpush1.bf16.msra.mxu0 %v3022_v43  ;;  %1145 = vmatpush1.bf16.msra.mxu1 %v3025_v44 }
  0x75   :  { %1000 = vmatprep.subr.bf16.mxu0 %v3030_v45  ;;  %1146 = vmatprep.subr.bf16.mxu1 %v3033_v46 }
  0x78   :  { %1001 = vmatpush1.bf16.msra.mxu0 %v3028_v47  ;;  %1147 = vmatpush1.bf16.msra.mxu1 %v3031_v48 }
  0x79   :  { %1002 = vmatprep.subr.bf16.mxu0 %v3039_v49  ;;  %1148 = vmatprep.subr.bf16.mxu1 %v3042_v50 }
  0x7c   :  { %1003 = vmatpush1.bf16.msra.mxu0 %v3037_v51  ;;  %1149 = vmatpush1.bf16.msra.mxu1 %v3040_v52 }
  0x7d   :  { %1004 = vmatprep.subr.bf16.mxu0 %v3045_v53  ;;  %1150 = vmatprep.subr.bf16.mxu1 %v3048_v54 }
  0x80   :  { %1005 = vmatpush1.bf16.msra.mxu0 %v3043_v55  ;;  %1151 = vmatpush1.bf16.msra.mxu1 %v3046_v56 }
  0x81   :  { %1006 = vmatprep.subr.bf16.mxu0 %v3054_v57  ;;  %1152 = vmatprep.subr.bf16.mxu1 %v3057_v58 }
  0x84   :  { %1007 = vmatpush1.bf16.msra.mxu0 %v3052_v59  ;;  %1153 = vmatpush1.bf16.msra.mxu1 %v3055_v60 }
  0x85   :  { %1008 = vmatprep.subr.bf16.mxu0 %v3060_v61  ;;  %1154 = vmatprep.subr.bf16.mxu1 %v3063_v62 }
  0x88   :  { %1009 = vmatpush1.bf16.msra.mxu0 %v3058_v63  ;;  %1155 = vmatpush1.bf16.msra.mxu1 %v3061_v0 }
  0x89   :  { %1010 = vmatprep.subr.bf16.mxu0 %v3069_v1  ;;  %1156 = vmatprep.subr.bf16.mxu1 %v3072_v2 }
  0x8c   :  { %1011 = vmatpush1.bf16.msra.mxu0 %v3067_v3  ;;  %1157 = vmatpush1.bf16.msra.mxu1 %v3070_v4 }
  0x8d   :  { %1012 = vmatprep.subr.bf16.mxu0 %v3075_v5  ;;  %1158 = vmatprep.subr.bf16.mxu1 %v3078_v6 }
  0x90   :  { %1013 = vmatpush1.bf16.msra.mxu0 %v3073_v7  ;;  %1159 = vmatpush1.bf16.msra.mxu1 %v3076_v8 }
  0x91   :  { %2591 = vmatprep.subr.bf16.mxu1 %v3095_v17  ;;  %v3106_v17 = vld [vmem:[%s3557_s3 + $0x28] sm:$0xff]  }
  0x93   :  { %1015 = vmatmul.mubr.bf16.vlgmr.msra.gmra.mrb[0].mxu0 %v3079_v9  ;;  %1161 = vmatmul.mubr.bf16.vlgmr.msra.gmra.mrb[0].mxu1 %v3079_v9 }
  0x94   :  { %1024 = vmatprep.mubr.bf16.mxu0 %v3082_v10  ;;  %1170 = vmatprep.mubr.bf16.mxu1 %v3082_v10 }
  0x95   :  { %2592 = vmatpush3.bf16.msra.mxu1 %v3096_v18  ;;  %v3107_v18 = vld [vmem:[%s3557_s3 + $0x70] sm:$0xff]  }
  0x96   :  { %2593 = vmatprep.subr.bf16.mxu1 %v3097_v19  ;;  %v3108_v19 = vld [vmem:[%s3557_s3 + $0x30] sm:$0xff]  }
  0x99   :  { %2594 = vmatpush3.bf16.msra.mxu1 %v3098_v20  ;;  %v3109_v20 = vld [vmem:[%s3557_s3 + $0x78] sm:$0xff]  }
  0x9a   :  { %2595 = vmatprep.subr.bf16.mxu1 %v3099_v21  ;;  %v3110_v21 = vld [vmem:[%s3557_s3 + $0x38] sm:$0xff]   ;;  %s3163_s3 = smov 64  }
  0x9b   :  { %1025 = vmatmul.mubr.bf16.gmra.mrb[4].mxu0 %v3084_v11  ;;  %1171 = vmatmul.mubr.bf16.gmra.mrb[4].mxu1 %v3084_v11 }
  0x9c   :  { %1034 = vmatprep.mubr.bf16.mxu0 %v3085_v12  ;;  %1180 = vmatprep.mubr.bf16.mxu1 %v3085_v12  ;;  %v3091_v12 = vld [vmem:[%s3554_s0] sm:$0xff]  }
  0x9d   :  { %2596 = vmatpush3.bf16.msra.mxu1 %v3100_v22  ;;  %v1226_v22 = vlaneseq }
  0x9e   :  { %2597 = vmatprep.subr.bf16.mxu1 %v3101_v23 }
  0x9f   :  { %v3344_v23 = vshrl.u32 %v1226_v22, 7 }
  0xa1   :  { %2598 = vmatpush3.bf16.msra.mxu1 %v3102_v24  ;;  %v1228_v24 = vsub.s32 0, %v3344_v23 }
  0xa2   :  { %2599 = vmatprep.subr.bf16.mxu1 %v3103_v25  ;;  %v3350_v25 = vld [vmem:[%s3561_s7] sm:$0xff] }
  0xa3   :  { %1035 = vmatmul.mubr.bf16.gmra.mrb[8].mxu0 %v3087_v13  ;;  %1181 = vmatmul.mubr.bf16.gmra.mrb[8].mxu1 %v3087_v13  ;;  %v3312_v13 = vld [vmem:[%s3554_s0 + $0x8] sm:$0xff]  }
  0xa4   :  { %1044 = vmatprep.mubr.bf16.mxu0 %v3088_v14  ;;  %1190 = vmatprep.mubr.bf16.mxu1 %v3088_v14  ;;  %v3319_v14 = vld [vmem:[%s3554_s0 + $0x10] sm:$0xff]  }
  0xa5   :  { %2600 = vmatpush3.bf16.msra.mxu1 %v3104_v26  ;;  %v1232_v26 = vsub.s32 4, %v3344_v23 }
  0xa6   :  { %2601 = vmatprep.subr.bf16.mxu1 %v3105_v27  ;;  %v1229_v27 = vrot.slane %v3350_v25, %v1228_v24 }
  0xa9   :  { %2602 = vmatpush3.bf16.msra.mxu1 %v3106_v17 }
  0xaa   :  { %2603 = vmatprep.subr.bf16.mxu1 %v3107_v18 }
  0xab   :  { %1045 = vmatmul.mubr.bf16.gmra.mrb[12].mxu0 %v3090_v15  ;;  %1191 = vmatmul.mubr.bf16.gmra.mrb[12].mxu1 %v3090_v15  ;;  %v3326_v15 = vld [vmem:[%s3554_s0 + $0x18] sm:$0xff]  }
  0xac   :  { %1300 = vmatprep.mubr.bf16.mxu0 %v3162_v16 }
  0xad   :  { %2604 = vmatpush3.bf16.msra.mxu1 %v3108_v19 }
  0xae   :  { %2605 = vmatprep.subr.bf16.mxu1 %v3109_v20 }
  0xb1   :  { %2606 = vmatpush3.bf16.msra.mxu1 %v3110_v21 }
 0x166   :  { %v1016_v28 = vpop.f32.mrb[0].mxu0  ;;  %v1162_v29 = vpop.f32.mrb[0].mxu1 }
 0x167   :  { %v1018_v30 = vpop.f32.mrb[1].mxu0  ;;  %v1164_v31 = vpop.f32.mrb[1].mxu1 }
 0x168   :  { %v1020_v32 = vpop.f32.mrb[2].mxu0  ;;  %v1166_v33 = vpop.f32.mrb[2].mxu1 }
 0x169   :  { %v1201_v34 = vpack.c.bf16 %v1020_v32, %v1016_v28  ;;  %v1209_v35 = vpack.c.bf16 %v1166_v33, %v1162_v29  ;;  %v1022_v36 = vpop.f32.mrb[3].mxu0  ;;  %v1168_v37 = vpop.f32.mrb[3].mxu1  ;;  %v1233_v28 = vrot.slane %v3350_v25, %v1232_v26  ;;  %v1239_v29 = vrot.slane %v1229_v27, %v1228_v24 }
 0x16a   :  { %v1202_v38 = vpack.c.bf16 %v1022_v36, %v1018_v30  ;;  %v1210_v39 = vpack.c.bf16 %v1168_v37, %v1164_v31 }
 0x16b   :  { %v1243_v30 = vrot.slane %v1233_v28, %v1228_v24 }
 0x16c   :  { %1268 = vmatprep.subr.bf16.mxu0 %v1202_v38 }
 0x16d   :  { %1269 = vmatpush1.bf16.msra.mxu0 %v1201_v34 }
 0x16e   :  { %v1026_v40 = vpop.f32.mrb[4].mxu0  ;;  %v1172_v41 = vpop.f32.mrb[4].mxu1 }
 0x16f   :  { %v1028_v42 = vpop.f32.mrb[5].mxu0  ;;  %v1174_v43 = vpop.f32.mrb[5].mxu1 }
 0x170   :  { %v1030_v44 = vpop.f32.mrb[6].mxu0  ;;  %v1176_v45 = vpop.f32.mrb[6].mxu1 }
 0x171   :  { %v1203_v46 = vpack.c.bf16 %v1030_v44, %v1026_v40  ;;  %v1211_v47 = vpack.c.bf16 %v1176_v45, %v1172_v41  ;;  %v1032_v48 = vpop.f32.mrb[7].mxu0  ;;  %v1178_v49 = vpop.f32.mrb[7].mxu1 }
 0x172   :  { %v1204_v50 = vpack.c.bf16 %v1032_v48, %v1028_v42  ;;  %v1212_v51 = vpack.c.bf16 %v1178_v49, %v1174_v43 }
 0x174   :  { %1270 = vmatprep.subr.bf16.mxu0 %v1204_v50 }
 0x175   :  { %1271 = vmatpush1.bf16.msra.mxu0 %v1203_v46 }
 0x176   :  { %v1036_v52 = vpop.f32.mrb[8].mxu0  ;;  %v1182_v53 = vpop.f32.mrb[8].mxu1 }
 0x177   :  { %v1038_v54 = vpop.f32.mrb[9].mxu0  ;;  %v1184_v55 = vpop.f32.mrb[9].mxu1 }
 0x178   :  { %v1040_v56 = vpop.f32.mrb[10].mxu0  ;;  %v1186_v57 = vpop.f32.mrb[10].mxu1 }
 0x179   :  { %v1205_v58 = vpack.c.bf16 %v1040_v56, %v1036_v52  ;;  %v1213_v59 = vpack.c.bf16 %v1186_v57, %v1182_v53  ;;  %v1042_v60 = vpop.f32.mrb[11].mxu0  ;;  %v1188_v61 = vpop.f32.mrb[11].mxu1 }
 0x17a   :  { %v1206_v62 = vpack.c.bf16 %v1042_v60, %v1038_v54  ;;  %v1214_v63 = vpack.c.bf16 %v1188_v61, %v1184_v55 }
 0x17c   :  { %1272 = vmatprep.subr.bf16.mxu0 %v1206_v62 }
 0x17d   :  { %1273 = vmatpush1.bf16.msra.mxu0 %v1205_v58 }
 0x17e   :  { %v1046_v0 = vpop.f32.mrb[12].mxu0  ;;  %v1192_v1 = vpop.f32.mrb[12].mxu1 }
 0x17f   :  { %v1048_v2 = vpop.f32.mrb[13].mxu0  ;;  %v1194_v3 = vpop.f32.mrb[13].mxu1 }
 0x180   :  { %v1050_v4 = vpop.f32.mrb[14].mxu0  ;;  %v1196_v5 = vpop.f32.mrb[14].mxu1 }
 0x181   :  { %v1207_v6 = vpack.c.bf16 %v1050_v4, %v1046_v0  ;;  %v1215_v7 = vpack.c.bf16 %v1196_v5, %v1192_v1  ;;  %v1052_v8 = vpop.f32.mrb[15].mxu0  ;;  %v1198_v9 = vpop.f32.mrb[15].mxu1 }
 0x182   :  { %v1208_v10 = vpack.c.bf16 %v1052_v8, %v1048_v2  ;;  %v1216_v11 = vpack.c.bf16 %v1198_v9, %v1194_v3 }
 0x184   :  { %1274 = vmatprep.subr.bf16.mxu0 %v1208_v10 }
 0x185   :  { %1275 = vmatpush1.bf16.msra.mxu0 %v1207_v6 }
 0x186   :  { %1276 = vmatprep.subr.bf16.mxu0 %v1210_v39 }
 0x189   :  { %1277 = vmatpush1.bf16.msra.mxu0 %v1209_v35 }
 0x18a   :  { %1278 = vmatprep.subr.bf16.mxu0 %v1212_v51 }
 0x18d   :  { %1279 = vmatpush1.bf16.msra.mxu0 %v1211_v47 }
 0x18e   :  { %1280 = vmatprep.subr.bf16.mxu0 %v1214_v63 }
 0x191   :  { %1281 = vmatpush1.bf16.msra.mxu0 %v1213_v59 }
 0x192   :  { %1282 = vmatprep.subr.bf16.mxu0 %v1216_v11 }
 0x195   :  { %1283 = vmatpush1.bf16.msra.mxu0 %v1215_v7 }
 0x198   :  { %1301 = vmatmul.mubr.bf16.vlgmr.msra.gmra.mrb[16].mxu0 %v3091_v12 }
 0x199   :  { %1310 = vmatprep.mubr.bf16.mxu0 %v3162_v16 }
 0x1a0   :  { %1311 = vmatmul.mubr.bf16.gmra.mrb[20].mxu0 %v3312_v13 }
 0x1a1   :  { %1320 = vmatprep.mubr.bf16.mxu0 %v3162_v16 }
 0x1a8   :  { %1321 = vmatmul.mubr.bf16.gmra.mrb[24].mxu0 %v3319_v14 }
 0x1a9   :  { %1330 = vmatprep.mubr.bf16.mxu0 %v3162_v16 }
 0x1b0   :  { %1331 = vmatmul.mubr.bf16.gmra.mrb[28].mxu0 %v3326_v15 }
 0x1b1   :  { %2695 = vmatprep.mubr.bf16.mxu0 %v3091_v12 }
 0x26b   :  { %v1302_v31 = vpop.f32.mrb[16].mxu0 }
 0x26c   :  { %v1303_v32 = vadd.f32 %v1302_v31, %v1239_v29  ;;  %v1304_v33 = vpop.f32.mrb[17].mxu0 }
 0x26d   :  { %v1305_v34 = vadd.f32 %v1304_v33, %v1243_v30  ;;  %v1306_v35 = vpop.f32.mrb[18].mxu0 }
 0x26e   :  { %v1307_v36 = vadd.f32 %v1306_v35, %v1239_v29  ;;  %v1308_v37 = vpop.f32.mrb[19].mxu0  ;;  %v1341_v39 = vmax.f32 %v1303_v32, 0.0 }
 0x26f   :  { %v1309_v38 = vadd.f32 %v1308_v37, %v1243_v30  ;;  %v1342_v41 = vmax.f32 %v1305_v34, 0.0 }
 0x270   :  { %v1343_v40 = vmax.f32 %v1307_v36, 0.0 }
 0x271   :  { %v1344_v42 = vmax.f32 %v1309_v38, 0.0 }
 0x272   :  { %v1357_v43 = vpack.c.bf16 %v1343_v40, %v1341_v39 }
 0x273   :  { %v1358_v44 = vpack.c.bf16 %v1344_v42, %v1342_v41  ;;  %v1312_v45 = vpop.f32.mrb[20].mxu0 }
 0x274   :  { %v1313_v46 = vadd.f32 %v1312_v45, %v1239_v29  ;;  %v1314_v47 = vpop.f32.mrb[21].mxu0 }
 0x275   :  { %v1315_v48 = vadd.f32 %v1314_v47, %v1243_v30  ;;  %v1316_v49 = vpop.f32.mrb[22].mxu0  ;;  %1525 = vmatprep.mubr.bf16.mxu1 %v1358_v44 }
 0x276   :  { %v1317_v50 = vadd.f32 %v1316_v49, %v1239_v29  ;;  %v1318_v51 = vpop.f32.mrb[23].mxu0  ;;  %1526 = vmatmul.mubr.bf16.vlgmr.msra.gmra.mrb[16].mxu1 %v1357_v43  ;;  %v1345_v53 = vmax.f32 %v1313_v46, 0.0 }
 0x277   :  { %v1319_v52 = vadd.f32 %v1318_v51, %v1243_v30  ;;  %v1346_v55 = vmax.f32 %v1315_v48, 0.0 }
 0x278   :  { %v1347_v54 = vmax.f32 %v1317_v50, 0.0 }
 0x279   :  { %v1348_v56 = vmax.f32 %v1319_v52, 0.0 }
 0x27a   :  { %v1359_v57 = vpack.c.bf16 %v1347_v54, %v1345_v53 }
 0x27b   :  { %v1360_v58 = vpack.c.bf16 %v1348_v56, %v1346_v55  ;;  %v1322_v59 = vpop.f32.mrb[24].mxu0 }
 0x27c   :  { %v1323_v60 = vadd.f32 %v1322_v59, %v1239_v29  ;;  %v1324_v61 = vpop.f32.mrb[25].mxu0 }
 0x27d   :  { %v1325_v62 = vadd.f32 %v1324_v61, %v1243_v30  ;;  %v1326_v63 = vpop.f32.mrb[26].mxu0  ;;  %1533 = vmatprep.mubr.bf16.mxu1 %v1360_v58 }
 0x27e   :  { %v1327_v0 = vadd.f32 %v1326_v63, %v1239_v29  ;;  %v1328_v1 = vpop.f32.mrb[27].mxu0  ;;  %1534 = vmatmul.mubr.bf16.gmra.mrb[20].mxu1 %v1359_v57  ;;  %v1349_v3 = vmax.f32 %v1323_v60, 0.0 }
 0x27f   :  { %v1329_v2 = vadd.f32 %v1328_v1, %v1243_v30  ;;  %v1350_v5 = vmax.f32 %v1325_v62, 0.0 }
 0x280   :  { %v1351_v4 = vmax.f32 %v1327_v0, 0.0 }
 0x281   :  { %v1352_v6 = vmax.f32 %v1329_v2, 0.0 }
 0x282   :  { %v1361_v7 = vpack.c.bf16 %v1351_v4, %v1349_v3 }
 0x283   :  { %v1362_v8 = vpack.c.bf16 %v1352_v6, %v1350_v5  ;;  %v1332_v9 = vpop.f32.mrb[28].mxu0 }
 0x284   :  { %v1333_v10 = vadd.f32 %v1332_v9, %v1239_v29  ;;  %v1334_v11 = vpop.f32.mrb[29].mxu0 }
 0x285   :  { %v1335_v12 = vadd.f32 %v1334_v11, %v1243_v30  ;;  %v1336_v17 = vpop.f32.mrb[30].mxu0  ;;  %1541 = vmatprep.mubr.bf16.mxu1 %v1362_v8 }
 0x286   :  { %v1337_v18 = vadd.f32 %v1336_v17, %v1239_v29  ;;  %v1338_v19 = vpop.f32.mrb[31].mxu0  ;;  %1542 = vmatmul.mubr.bf16.gmra.mrb[24].mxu1 %v1361_v7  ;;  %v1353_v21 = vmax.f32 %v1333_v10, 0.0  ;;  %v3111_v17 = vld [vmem:[%s3558_s4] sm:$0xff]  }
 0x287   :  { %v1339_v20 = vadd.f32 %v1338_v19, %v1243_v30  ;;  %v1354_v24 = vmax.f32 %v1335_v12, 0.0 }
 0x288   :  { %v1355_v22 = vmax.f32 %v1337_v18, 0.0  ;;  %v1600_v18 = vsub.s32 1, %v3344_v23 }
 0x289   :  { %v1356_v26 = vmax.f32 %v1339_v20, 0.0 }
 0x28a   :  { %v1363_v27 = vpack.c.bf16 %v1355_v22, %v1353_v21  ;;  %v1601_v19 = vrot.slane %v3350_v25, %v1600_v18 }
 0x28b   :  { %v1364_v28 = vpack.c.bf16 %v1356_v26, %v1354_v24 }
 0x28d   :  { %1549 = vmatprep.mubr.bf16.mxu1 %v1364_v28 }
 0x28e   :  { %1550 = vmatmul.mubr.bf16.gmra.mrb[28].mxu1 %v1363_v27 }
 0x28f   :  { %2711 = vmatprep.mubr.msk.bf16.mxu1 %vm1783_vm0, %v3111_v17 }
 0x349   :  { %v2607_v31 = vpop.f32.mrb[16].mxu1 }
 0x34a   :  { %v2608_v32 = vpop.f32.mrb[17].mxu1 }
 0x34b   :  { %v2609_v33 = vadd.f32 %v2608_v32, %v2607_v31  ;;  %v2610_v34 = vpop.f32.mrb[18].mxu1 }
 0x34c   :  { %v2611_v35 = vpop.f32.mrb[19].mxu1 }
 0x34d   :  { %v2612_v36 = vadd.f32 %v2611_v35, %v2610_v34 }
 0x34f   :  { %v1590_v37 = vpack.c.bf16 %v2612_v36, %v2609_v33  ;;  %v2813_v38 = vpack.i.bf16 %v2612_v36, %v2609_v33 }
 0x351   :  { %v2613_v29 = vpop.f32.mrb[20].mxu1  ;;  %2814 = vrot.lane.b32.xlu0 %v2813_v38, %s3163_s3  ;;  %2679 = vmatprep.subr.bf16.mxu0 %v1590_v37 }
 0x352   :  { %v2614_v30 = vpop.f32.mrb[21].mxu1  ;;  %2680 = vmatpush3.bf16.msra.mxu0 %v1590_v37 }
 0x353   :  { %v2615_v39 = vadd.f32 %v2614_v30, %v2613_v29  ;;  %v2616_v40 = vpop.f32.mrb[22].mxu1 }
 0x354   :  { %v2617_v41 = vpop.f32.mrb[23].mxu1 }
 0x355   :  { %v2618_v42 = vadd.f32 %v2617_v41, %v2616_v40  ;;  %v3113_v40 = vld [vmem:[%s3558_s4 + $0x10] sm:$0xff]   ;;  %v3114_v41 = vld [vmem:[%s3558_s4 + $0x18] sm:$0xff]  }
 0x357   :  { %v2818_v43 = vpack.i.bf16 %v2618_v42, %v2615_v39  ;;  %v1591_v44 = vpack.c.bf16 %v2618_v42, %v2615_v39  ;;  %v3112_v39 = vld [vmem:[%s3558_s4 + $0x8] sm:$0xff]   ;;  %v3115_v42 = vld [vmem:[%s3558_s4 + $0x20] sm:$0xff]  }
 0x359   :  { %v2619_v45 = vpop.f32.mrb[24].mxu1  ;;  %2819 = vrot.lane.b32.xlu0 %v2818_v43, %s3163_s3  ;;  %2681 = vmatprep.subr.bf16.mxu0 %v1591_v44  ;;  %v3116_v43 = vld [vmem:[%s3558_s4 + $0x28] sm:$0xff]  }
 0x35a   :  { %v2620_v46 = vpop.f32.mrb[25].mxu1  ;;  %2682 = vmatpush3.bf16.msra.mxu0 %v1591_v44  ;;  %v3117_v44 = vld [vmem:[%s3558_s4 + $0x30] sm:$0xff]  }
 0x35b   :  { %v2621_v47 = vadd.f32 %v2620_v46, %v2619_v45  ;;  %v2622_v48 = vpop.f32.mrb[26].mxu1  ;;  %v3118_v45 = vld [vmem:[%s3558_s4 + $0x38] sm:$0xff]   ;;  %v3119_v46 = vld [vmem:[%s3558_s4 + $0x40] sm:$0xff]  }
 0x35c   :  { %v2623_v49 = vpop.f32.mrb[27].mxu1 }
 0x35d   :  { %v2624_v50 = vadd.f32 %v2623_v49, %v2622_v48  ;;  %v3121_v48 = vld [vmem:[%s3558_s4 + $0x50] sm:$0xff]   ;;  %v3122_v49 = vld [vmem:[%s3558_s4 + $0x58] sm:$0xff]  }
 0x35f   :  { %v1592_v51 = vpack.c.bf16 %v2624_v50, %v2621_v47  ;;  %v2823_v52 = vpack.i.bf16 %v2624_v50, %v2621_v47  ;;  %v3120_v47 = vld [vmem:[%s3558_s4 + $0x48] sm:$0xff]   ;;  %v3123_v50 = vld [vmem:[%s3558_s4 + $0x60] sm:$0xff]  }
 0x361   :  { %v2625_v53 = vpop.f32.mrb[28].mxu1  ;;  %2824 = vrot.lane.b32.xlu1 %v2823_v52, %s3163_s3  ;;  %2683 = vmatprep.subr.bf16.mxu0 %v1592_v51  ;;  %v3125_v52 = vld [vmem:[%s3558_s4 + $0x70] sm:$0xff]  }
 0x362   :  { %v2626_v54 = vpop.f32.mrb[29].mxu1  ;;  %2684 = vmatpush3.bf16.msra.mxu0 %v1592_v51  ;;  %v3124_v51 = vld [vmem:[%s3558_s4 + $0x68] sm:$0xff]  }
 0x363   :  { %v2627_v55 = vadd.f32 %v2626_v54, %v2625_v53  ;;  %v2628_v56 = vpop.f32.mrb[30].mxu1  ;;  %v3126_v53 = vld [vmem:[%s3558_s4 + $0x78] sm:$0xff]   ;;  %v3127_v54 = vld [vmem:[%s3559_s5] sm:$0xff]  }
 0x364   :  { %v2629_v57 = vpop.f32.mrb[31].mxu1 }
 0x365   :  { %v2630_v58 = vadd.f32 %v2629_v57, %v2628_v56  ;;  %v3129_v56 = vld [vmem:[%s3559_s5 + $0x10] sm:$0xff]   ;;  %v3130_v57 = vld [vmem:[%s3559_s5 + $0x18] sm:$0xff]  }
 0x367   :  { %v2828_v59 = vpack.i.bf16 %v2630_v58, %v2627_v55  ;;  %v1593_v60 = vpack.c.bf16 %v2630_v58, %v2627_v55  ;;  %v3128_v55 = vld [vmem:[%s3559_s5 + $0x8] sm:$0xff]   ;;  %v3131_v58 = vld [vmem:[%s3559_s5 + $0x20] sm:$0xff]  }
 0x369   :  { %2829 = vrot.lane.b32.xlu1 %v2828_v59, %s3163_s3  ;;  %2685 = vmatprep.subr.bf16.mxu0 %v1593_v60  ;;  %v3132_v59 = vld [vmem:[%s3559_s5 + $0x28] sm:$0xff]  }
 0x36a   :  { %2686 = vmatpush3.bf16.msra.mxu0 %v1593_v60  ;;  %v3133_v60 = vld [vmem:[%s3559_s5 + $0x30] sm:$0xff]  }
 0x3c3   :  { %v2815_v61 = vpop.permute.xlu0 %2814 }
 0x3c4   :  { %v2817_v62 = vunpack.i.h.bf16 %v2815_v61  ;;  %v2816_v63 = vunpack.i.l.bf16 %v2815_v61 }
 0x3c6   :  { %v1594_v0 = vpack.c.bf16 %v2817_v62, %v2816_v63 }
 0x3c8   :  { %2687 = vmatprep.subr.bf16.mxu0 %v1594_v0 }
 0x3c9   :  { %2688 = vmatpush3.bf16.msra.mxu0 %v1594_v0 }
 0x3cb   :  { %v2820_v1 = vpop.permute.xlu0 %2819 }
 0x3cc   :  { %v2822_v2 = vunpack.i.h.bf16 %v2820_v1  ;;  %v2821_v3 = vunpack.i.l.bf16 %v2820_v1 }
 0x3ce   :  { %v1595_v4 = vpack.c.bf16 %v2822_v2, %v2821_v3 }
 0x3d0   :  { %2689 = vmatprep.subr.bf16.mxu0 %v1595_v4 }
 0x3d1   :  { %2690 = vmatpush3.bf16.msra.mxu0 %v1595_v4 }
 0x3d3   :  { %v2825_v5 = vpop.permute.xlu1 %2824 }
 0x3d4   :  { %v2827_v6 = vunpack.i.h.bf16 %v2825_v5  ;;  %v2826_v7 = vunpack.i.l.bf16 %v2825_v5 }
 0x3d6   :  { %v1596_v8 = vpack.c.bf16 %v2827_v6, %v2826_v7 }
 0x3d8   :  { %2691 = vmatprep.subr.bf16.mxu0 %v1596_v8 }
 0x3d9   :  { %2692 = vmatpush3.bf16.msra.mxu0 %v1596_v8 }
 0x3db   :  { %v2830_v9 = vpop.permute.xlu1 %2829 }
 0x3dc   :  { %v2832_v10 = vunpack.i.h.bf16 %v2830_v9  ;;  %v2831_v11 = vunpack.i.l.bf16 %v2830_v9 }
 0x3de   :  { %v1597_v12 = vpack.c.bf16 %v2832_v10, %v2831_v11  ;;  %v3134_v11 = vld [vmem:[%s3559_s5 + $0x38] sm:$0xff]  }
 0x3e0   :  { %2693 = vmatprep.subr.bf16.mxu0 %v1597_v12 }
 0x3e1   :  { %2694 = vmatpush3.bf16.msra.mxu0 %v1597_v12 }
 0x3e2   :  { %2743 = vmatprep.subr.bf16.mxu0 %v3127_v54 }
 0x3e4   :  { %2696 = vmatmul.mubr.bf16.vlgmr.msra.gmra.mrb[32].mxu0 %v3312_v13 }
 0x3e5   :  { %2699 = vmatprep.mubr.bf16.mxu0 %v3319_v14  ;;  %2744 = vmatpush3.bf16.msra.mxu0 %v3127_v54 }
 0x3e6   :  { %2745 = vmatprep.subr.bf16.mxu0 %v3128_v55 }
 0x3e9   :  { %2746 = vmatpush3.bf16.msra.mxu0 %v3128_v55 }
 0x3ea   :  { %2747 = vmatprep.subr.bf16.mxu0 %v3129_v56 }
 0x3ec   :  { %2700 = vmatmul.mubr.bf16.gmra.mrb[36].mxu0 %v3326_v15 }
 0x3ed   :  { %2748 = vmatpush3.bf16.msra.mxu0 %v3129_v56 }
 0x3ee   :  { %2749 = vmatprep.subr.bf16.mxu0 %v3130_v57 }
 0x3f1   :  { %2750 = vmatpush3.bf16.msra.mxu0 %v3130_v57 }
 0x3f2   :  { %2751 = vmatprep.subr.bf16.mxu0 %v3131_v58 }
 0x3f5   :  { %2752 = vmatpush3.bf16.msra.mxu0 %v3131_v58 }
 0x3f6   :  { %2753 = vmatprep.subr.bf16.mxu0 %v3132_v59 }
 0x3f9   :  { %2754 = vmatpush3.bf16.msra.mxu0 %v3132_v59 }
 0x3fa   :  { %2755 = vmatprep.subr.bf16.mxu0 %v3133_v60 }
 0x3fd   :  { %2756 = vmatpush3.bf16.msra.mxu0 %v3133_v60 }
 0x3fe   :  { %2757 = vmatprep.subr.bf16.mxu0 %v3134_v11 }
 0x401   :  { %2758 = vmatpush3.bf16.msra.mxu0 %v3134_v11 }
 0x4b7   :  { %v2697_v20 = vpop.f32.mrb[32].mxu0 }
 0x4b8   :  { %v1636_v21 = vpop.f32.mrb[33].mxu0  ;;  %v1645_v24 = vadd.f32 %v2697_v20, %v1601_v19 }
 0x4b9   :  { %v2698_v22 = vpop.f32.mrb[34].mxu0  ;;  %v1637_v14 = vadd.f32 %v1636_v21, %v1601_v19 }
 0x4ba   :  { %v1648_v13 = vadd.f32 %v2698_v22, %v1601_v19  ;;  %v1639_v26 = vpop.f32.mrb[35].mxu0 }
 0x4bb   :  { %v1640_v27 = vadd.f32 %v1639_v26, %v1601_v19 }
 0x4bc   :  { %v1668_v15 = vpack.c.bf16 %v1648_v13, %v1645_v24 }
 0x4bd   :  { %v1667_v28 = vpack.c.bf16 %v1640_v27, %v1637_v14 }
 0x4bf   :  { %v2701_v31 = vpop.f32.mrb[36].mxu0  ;;  %2703 = vmatprep.subr.bf16.mxu1 %v1667_v28 }
 0x4c0   :  { %v1652_v32 = vpop.f32.mrb[37].mxu0  ;;  %2704 = vmatpush3.bf16.msra.mxu1 %v1667_v28  ;;  %v1661_v34 = vadd.f32 %v2701_v31, %v1601_v19 }
 0x4c1   :  { %v2702_v33 = vpop.f32.mrb[38].mxu0  ;;  %2705 = vmatprep.subr.bf16.mxu1 %v1668_v15  ;;  %v1653_v37 = vadd.f32 %v1652_v32, %v1601_v19 }
 0x4c2   :  { %v1664_v35 = vadd.f32 %v2702_v33, %v1601_v19  ;;  %v1655_v36 = vpop.f32.mrb[39].mxu0 }
 0x4c3   :  { %v1656_v38 = vadd.f32 %v1655_v36, %v1601_v19 }
 0x4c4   :  { %v1670_v29 = vpack.c.bf16 %v1664_v35, %v1661_v34  ;;  %2706 = vmatpush3.bf16.msra.mxu1 %v1668_v15 }
 0x4c5   :  { %v1669_v30 = vpack.c.bf16 %v1656_v38, %v1653_v37 }
 0x4c7   :  { %2707 = vmatprep.subr.bf16.mxu1 %v1669_v30 }
 0x4c8   :  { %2708 = vmatpush3.bf16.msra.mxu1 %v1669_v30 }
 0x4c9   :  { %2709 = vmatprep.subr.bf16.mxu1 %v1670_v29 }
 0x4cc   :  { %2710 = vmatpush3.bf16.msra.mxu1 %v1670_v29 }
 0x4cf   :  { %2712 = vmatmul.mubr.msk.bf16.vlgmr.msra.gmra.mrb[32].mxu1 %vm1783_vm0, %v3112_v39 }
 0x4d0   :  { %2715 = vmatprep.mubr.msk.bf16.mxu1 %vm1783_vm0, %v3113_v40 }
 0x4d7   :  { %2716 = vmatmul.mubr.msk.bf16.gmra.mrb[36].mxu1 %vm1783_vm0, %v3114_v41  ;;  %v2294_v41 = vld [vmem:[%s3560_s6] sm:$0xff] }
 0x4d8   :  { %2719 = vmatprep.mubr.msk.bf16.mxu1 %vm1783_vm0, %v3115_v42  ;;  %v2295_v42 = vld [vmem:[%s3560_s6 + $0x8] sm:$0xff] }
 0x4df   :  { %2720 = vmatmul.mubr.msk.bf16.gmra.mrb[40].mxu1 %vm1783_vm0, %v3116_v43 }
 0x4e0   :  { %2723 = vmatprep.mubr.msk.bf16.mxu1 %vm1783_vm0, %v3117_v44 }
 0x4e7   :  { %2724 = vmatmul.mubr.msk.bf16.gmra.mrb[44].mxu1 %vm1783_vm0, %v3118_v45 }
 0x4e8   :  { %2727 = vmatprep.mubr.msk.bf16.mxu1 %vm1783_vm0, %v3119_v46 }
 0x4ef   :  { %2728 = vmatmul.mubr.msk.bf16.gmra.mrb[48].mxu1 %vm1783_vm0, %v3120_v47 }
 0x4f0   :  { %2731 = vmatprep.mubr.msk.bf16.mxu1 %vm1783_vm0, %v3121_v48 }
 0x4f7   :  { %2732 = vmatmul.mubr.msk.bf16.gmra.mrb[52].mxu1 %vm1783_vm0, %v3122_v49 }
 0x4f8   :  { %2735 = vmatprep.mubr.msk.bf16.mxu1 %vm1783_vm0, %v3123_v50 }
 0x4ff   :  { %2736 = vmatmul.mubr.msk.bf16.gmra.mrb[56].mxu1 %vm1783_vm0, %v3124_v51 }
 0x500   :  { %2739 = vmatprep.mubr.msk.bf16.mxu1 %vm1783_vm0, %v3125_v52 }
 0x507   :  { %2740 = vmatmul.mubr.msk.bf16.gmra.mrb[60].mxu1 %vm1783_vm0, %v3126_v53 }
 0x5a2   :  { %v3449_v61 = vpop.f32.mrb[32].mxu1 }
 0x5a3   :  { %v3451_v62 = vpop.f32.mrb[33].mxu1 }
 0x5a4   :  { %v2714_v63 = vpop.f32.mrb[34].mxu1 }
 0x5a5   :  { %v3453_v0 = vpop.f32.mrb[35].mxu1 }
 0x5aa   :  { %v3455_v1 = vpop.f32.mrb[36].mxu1 }
 0x5ab   :  { %v3457_v2 = vpop.f32.mrb[37].mxu1 }
 0x5ac   :  { %v3459_v3 = vpop.f32.mrb[38].mxu1 }
 0x5ad   :  { %v3461_v4 = vpop.f32.mrb[39].mxu1 }
 0x5b2   :  { %v3463_v5 = vpop.f32.mrb[40].mxu1 }
 0x5b3   :  { %v3465_v6 = vpop.f32.mrb[41].mxu1 }
 0x5b4   :  { %v3467_v7 = vpop.f32.mrb[42].mxu1 }
 0x5b5   :  { %v3469_v8 = vpop.f32.mrb[43].mxu1 }
 0x5ba   :  { %v3471_v9 = vpop.f32.mrb[44].mxu1 }
 0x5bb   :  { %v3473_v10 = vpop.f32.mrb[45].mxu1 }
 0x5bc   :  { %v3478_v12 = vpop.f32.mrb[46].mxu1 }
 0x5bd   :  { %v3480_v17 = vpop.f32.mrb[47].mxu1 }
 0x5c2   :  { %v2729_v18 = vpop.f32.mrb[48].mxu1 }
 0x5c3   :  { %v1930_v19 = vpop.f32.mrb[49].mxu1 }
 0x5c4   :  { %v2730_v20 = vpop.f32.mrb[50].mxu1 }
 0x5c5   :  { %v2838_v21 = vpack.i.bf16 %v2730_v20, %v2729_v18  ;;  %v1933_v22 = vpop.f32.mrb[51].mxu1 }
 0x5c6   :  { %v2833_v24 = vpack.i.bf16 %v1933_v22, %v1930_v19 }
 0x5c7   :  { %2839 = vrot.lane.b32.xlu1 %v2838_v21, %s3163_s3 }
 0x5c8   :  { %2834 = vrot.lane.b32.xlu0 %v2833_v24, %s3163_s3 }
 0x5ca   :  { %v2733_v13 = vpop.f32.mrb[52].mxu1 }
 0x5cb   :  { %v1946_v26 = vpop.f32.mrb[53].mxu1 }
 0x5cc   :  { %v2734_v14 = vpop.f32.mrb[54].mxu1 }
 0x5cd   :  { %v2848_v27 = vpack.i.bf16 %v2734_v14, %v2733_v13  ;;  %v1949_v15 = vpop.f32.mrb[55].mxu1 }
 0x5ce   :  { %v2843_v28 = vpack.i.bf16 %v1949_v15, %v1946_v26 }
 0x5cf   :  { %2849 = vrot.lane.b32.xlu1 %v2848_v27, %s3163_s3 }
 0x5d0   :  { %2844 = vrot.lane.b32.xlu0 %v2843_v28, %s3163_s3 }
 0x5d2   :  { %v2737_v31 = vpop.f32.mrb[56].mxu1 }
 0x5d3   :  { %v1962_v32 = vpop.f32.mrb[57].mxu1 }
 0x5d4   :  { %v2738_v33 = vpop.f32.mrb[58].mxu1 }
 0x5d5   :  { %v2858_v34 = vpack.i.bf16 %v2738_v33, %v2737_v31  ;;  %v1965_v35 = vpop.f32.mrb[59].mxu1 }
 0x5d6   :  { %v2853_v36 = vpack.i.bf16 %v1965_v35, %v1962_v32 }
 0x5d7   :  { %2859 = vrot.lane.b32.xlu1 %v2858_v34, %s3163_s3 }
 0x5d8   :  { %2854 = vrot.lane.b32.xlu0 %v2853_v36, %s3163_s3  ;;  %v2296_v36 = vld [vmem:[%s3560_s6 + $0x10] sm:$0xff] }
 0x5da   :  { %v2741_v37 = vpop.f32.mrb[60].mxu1 }
 0x5db   :  { %v1978_v38 = vpop.f32.mrb[61].mxu1 }
 0x5dc   :  { %v2742_v29 = vpop.f32.mrb[62].mxu1 }
 0x5dd   :  { %v2868_v30 = vpack.i.bf16 %v2742_v29, %v2741_v37  ;;  %v1981_v39 = vpop.f32.mrb[63].mxu1  ;;  %v2301_v37 = vld [vmem:[%s3560_s6 + $0x38] sm:$0xff] }
 0x5de   :  { %v2863_v40 = vpack.i.bf16 %v1981_v39, %v1978_v38  ;;  %v2099_v38 = vsub.s32 2, %v3344_v23 }
 0x5df   :  { %2869 = vrot.lane.b32.xlu1 %v2868_v30, %s3163_s3 }
 0x5e0   :  { %2864 = vrot.lane.b32.xlu0 %v2863_v40, %s3163_s3  ;;  %v2100_v29 = vrot.slane %v3350_v25, %v2099_v38 }
 0x5e3   :  { %2304 = vperm.xlu1 %2873, %v2294_v41  }
 0x5e7   :  { %2309 = vperm.xlu1 %2873, %v2295_v42  }
 0x5eb   :  { %2314 = vperm.xlu1 %2873, %v2296_v36  }
 0x639   :  { %v2840_v43 = vpop.permute.xlu1 %2839 }
 0x63a   :  { %v2842_v44 = vunpack.i.h.bf16 %v2840_v43  ;;  %v2841_v45 = vunpack.i.l.bf16 %v2840_v43  ;;  %v2835_v46 = vpop.permute.xlu0 %2834 }
 0x63b   :  { %v2837_v47 = vunpack.i.h.bf16 %v2835_v46  ;;  %v2836_v48 = vunpack.i.l.bf16 %v2835_v46 }
 0x63c   :  { %v2060_v49 = vsel %vm1783_vm0, %v2714_v63, %v2842_v44  ;;  %v2059_v50 = vsel %vm1783_vm0, %v3449_v61, %v2841_v45 }
 0x63d   :  { %v2074_v51 = vpack.c.bf16 %v2060_v49, %v2059_v50  ;;  %v2057_v52 = vsel %vm1783_vm0, %v3451_v62, %v2836_v48  ;;  %v2058_v53 = vsel %vm1783_vm0, %v3453_v0, %v2837_v47 }
 0x63e   :  { %v2073_v54 = vpack.c.bf16 %v2058_v53, %v2057_v52 }
 0x640   :  { %2759 = vmatprep.mubr.bf16.mxu0 %v2073_v54 }
 0x641   :  { %2760 = vmatmul.mubr.bf16.vlgmr.msra.gmra.mrb[40].mxu0 %v2074_v51  ;;  %v2850_v55 = vpop.permute.xlu1 %2849 }
 0x642   :  { %v2852_v56 = vunpack.i.h.bf16 %v2850_v55  ;;  %v2851_v57 = vunpack.i.l.bf16 %v2850_v55  ;;  %v2845_v58 = vpop.permute.xlu0 %2844 }
 0x643   :  { %v2847_v59 = vunpack.i.h.bf16 %v2845_v58  ;;  %v2846_v60 = vunpack.i.l.bf16 %v2845_v58 }
 0x644   :  { %v2063_v63 = vsel %vm1783_vm0, %v3455_v1, %v2851_v57  ;;  %v2064_v61 = vsel %vm1783_vm0, %v3459_v3, %v2852_v56 }
 0x645   :  { %v2061_v62 = vsel %vm1783_vm0, %v3457_v2, %v2846_v60  ;;  %v2062_v0 = vsel %vm1783_vm0, %v3461_v4, %v2847_v59  ;;  %v2076_v11 = vpack.c.bf16 %v2064_v61, %v2063_v63 }
 0x646   :  { %v2075_v18 = vpack.c.bf16 %v2062_v0, %v2061_v62 }
 0x648   :  { %2763 = vmatprep.mubr.bf16.mxu0 %v2075_v18 }
 0x649   :  { %2764 = vmatmul.mubr.bf16.gmra.mrb[44].mxu0 %v2076_v11  ;;  %v2860_v19 = vpop.permute.xlu1 %2859 }
 0x64a   :  { %v2862_v20 = vunpack.i.h.bf16 %v2860_v19  ;;  %v2861_v21 = vunpack.i.l.bf16 %v2860_v19  ;;  %v2855_v22 = vpop.permute.xlu0 %2854 }
 0x64b   :  { %v2857_v24 = vunpack.i.h.bf16 %v2855_v22  ;;  %v2856_v13 = vunpack.i.l.bf16 %v2855_v22 }
 0x64c   :  { %v2067_v1 = vsel %vm1783_vm0, %v3463_v5, %v2861_v21  ;;  %v2068_v3 = vsel %vm1783_vm0, %v3467_v7, %v2862_v20 }
 0x64d   :  { %v2065_v2 = vsel %vm1783_vm0, %v3465_v6, %v2856_v13  ;;  %v2066_v4 = vsel %vm1783_vm0, %v3469_v8, %v2857_v24  ;;  %v2078_v26 = vpack.c.bf16 %v2068_v3, %v2067_v1 }
 0x64e   :  { %v2077_v14 = vpack.c.bf16 %v2066_v4, %v2065_v2 }
 0x650   :  { %2767 = vmatprep.mubr.bf16.mxu0 %v2077_v14 }
 0x651   :  { %2768 = vmatmul.mubr.bf16.gmra.mrb[48].mxu0 %v2078_v26  ;;  %v2870_v27 = vpop.permute.xlu1 %2869 }
 0x652   :  { %v2872_v15 = vunpack.i.h.bf16 %v2870_v27  ;;  %v2871_v28 = vunpack.i.l.bf16 %v2870_v27  ;;  %v2865_v31 = vpop.permute.xlu0 %2864 }
 0x653   :  { %v2867_v32 = vunpack.i.h.bf16 %v2865_v31  ;;  %v2866_v33 = vunpack.i.l.bf16 %v2865_v31 }
 0x654   :  { %v2071_v5 = vsel %vm1783_vm0, %v3471_v9, %v2871_v28  ;;  %v2072_v7 = vsel %vm1783_vm0, %v3478_v12, %v2872_v15  ;;  %v2297_v9 = vld [vmem:[%s3560_s6 + $0x18] sm:$0xff]  ;;  %v2299_v12 = vld [vmem:[%s3560_s6 + $0x28] sm:$0xff] }
 0x655   :  { %v2069_v6 = vsel %vm1783_vm0, %v3473_v10, %v2866_v33  ;;  %v2070_v8 = vsel %vm1783_vm0, %v3480_v17, %v2867_v32  ;;  %v2080_v34 = vpack.c.bf16 %v2072_v7, %v2071_v5  ;;  %2319 = vperm.xlu1 %2873, %v2297_v9   ;;  %v2298_v10 = vld [vmem:[%s3560_s6 + $0x20] sm:$0xff]  ;;  %v2300_v17 = vld [vmem:[%s3560_s6 + $0x30] sm:$0xff] }
 0x656   :  { %v2079_v35 = vpack.c.bf16 %v2070_v8, %v2069_v6 }
 0x658   :  { %2771 = vmatprep.mubr.bf16.mxu0 %v2079_v35 }
 0x659   :  { %2772 = vmatmul.mubr.bf16.gmra.mrb[52].mxu0 %v2080_v34  ;;  %2324 = vperm.xlu1 %2873, %v2298_v10  }
 0x65d   :  { %2329 = vperm.xlu1 %2873, %v2299_v12  }
 0x661   :  { %2334 = vperm.xlu1 %2873, %v2300_v17  }
 0x662   :  { %v2305_v5 = vpop.permute.xlu1 %2304 }
 0x665   :  { %2339 = vperm.xlu1 %2873, %v2301_v37  }
 0x666   :  { %v2310_v7 = vpop.permute.xlu1 %2309 }
 0x669   :  { %2364 = vperm.xlu1 %2873, %v3350_v25  }
 0x66a   :  { %v2315_v6 = vpop.permute.xlu1 %2314 }
 0x6d4   :  { %v2320_v34 = vpop.permute.xlu1 %2319 }
 0x6d8   :  { %v2325_v9 = vpop.permute.xlu1 %2324 }
 0x6dc   :  { %v2330_v17 = vpop.permute.xlu1 %2329 }
 0x714   :  { %v2761_v30 = vpop.f32.mrb[40].mxu0 }
 0x715   :  { %v2183_v39 = vpop.f32.mrb[41].mxu0  ;;  %v2192_v45 = vadd.f32 %v2761_v30, %v2100_v29 }
 0x716   :  { %v2184_v40 = vadd.f32 %v2183_v39, %v2100_v29  ;;  %v2762_v41 = vpop.f32.mrb[42].mxu0 }
 0x717   :  { %v2186_v42 = vpop.f32.mrb[43].mxu0  ;;  %v2248_v51 = vmax.f32 %v2192_v45, 0.0  ;;  %v2195_v52 = vadd.f32 %v2762_v41, %v2100_v29 }
 0x718   :  { %v2246_v43 = vmax.f32 %v2184_v40, 0.0  ;;  %v2187_v44 = vadd.f32 %v2186_v42, %v2100_v29 }
 0x719   :  { %v2249_v53 = vmax.f32 %v2195_v52, 0.0 }
 0x71a   :  { %2262 = vxpose.xlu0.b32.start [1/16] (narrow) %v2246_v43, 64  ;;  %v2247_v46 = vmax.f32 %v2187_v44, 0.0 }
 0x71c   :  { %v2765_v47 = vpop.f32.mrb[44].mxu0 }
 0x71d   :  { %v2199_v48 = vpop.f32.mrb[45].mxu0  ;;  %v2208_v60 = vadd.f32 %v2765_v47, %v2100_v29 }
 0x71e   :  { %v2766_v49 = vpop.f32.mrb[46].mxu0  ;;  %2263 = vxpose.xlu0.b32.cont [2/16] (narrow) %v2247_v46, 64  ;;  %v2200_v25 = vadd.f32 %v2199_v48, %v2100_v29  ;;  %v3164_v48 = vmov 839922192  }
 0x71f   :  { %v2202_v50 = vpop.f32.mrb[47].mxu0  ;;  %v2252_v18 = vmax.f32 %v2208_v60, 0.0  ;;  %v2211_v19 = vadd.f32 %v2766_v49, %v2100_v29  ;;  %v2368_v49 = vunpack.c.l.s4 %v3164_v48 }
 0x720   :  { %v2250_v58 = vmax.f32 %v2200_v25, 0.0  ;;  %v2203_v59 = vadd.f32 %v2202_v50, %v2100_v29 }
 0x721   :  { %v2253_v20 = vmax.f32 %v2211_v19, 0.0 }
 0x722   :  { %2264 = vxpose.xlu0.b32.cont [3/16] (narrow) %v2248_v51, 64  ;;  %v2251_v63 = vmax.f32 %v2203_v59, 0.0 }
 0x724   :  { %v2769_v54 = vpop.f32.mrb[48].mxu0 }
 0x725   :  { %v2215_v55 = vpop.f32.mrb[49].mxu0  ;;  %v2224_v13 = vadd.f32 %v2769_v54, %v2100_v29  ;;  %v2369_v54 = vunpack.c.0.s8 %v2368_v49 }
 0x726   :  { %v2770_v56 = vpop.f32.mrb[50].mxu0  ;;  %2265 = vxpose.xlu0.b32.cont [4/16] (narrow) %v2249_v53, 64  ;;  %v2216_v21 = vadd.f32 %v2215_v55, %v2100_v29 }
 0x727   :  { %v2218_v57 = vpop.f32.mrb[51].mxu0  ;;  %v2256_v3 = vmax.f32 %v2224_v13, 0.0  ;;  %v2227_v2 = vadd.f32 %v2770_v56, %v2100_v29 }
 0x728   :  { %v2254_v22 = vmax.f32 %v2216_v21, 0.0  ;;  %v2219_v24 = vadd.f32 %v2218_v57, %v2100_v29  ;;  %v2372_v57 = vsub.s32 %v2369_v54, %v3344_v23 }
 0x729   :  { %v2257_v4 = vmax.f32 %v2227_v2, 0.0 }
 0x72a   :  { %2266 = vxpose.xlu0.b32.cont [5/16] (narrow) %v2250_v58, 64  ;;  %v2255_v1 = vmax.f32 %v2219_v24, 0.0 }
 0x72c   :  { %v2773_v61 = vpop.f32.mrb[52].mxu0 }
 0x72d   :  { %v2231_v62 = vpop.f32.mrb[53].mxu0  ;;  %v2240_v15 = vadd.f32 %v2773_v61, %v2100_v29 }
 0x72e   :  { %2267 = vxpose.xlu0.b32.cont [6/16] (narrow) %v2251_v63, 64  ;;  %v2774_v0 = vpop.f32.mrb[54].mxu0  ;;  %v2232_v26 = vadd.f32 %v2231_v62, %v2100_v29  ;;  %v2377_v63 = vsub.s32 3, %v3344_v23 }
 0x72f   :  { %v2234_v11 = vpop.f32.mrb[55].mxu0  ;;  %v2260_v31 = vmax.f32 %v2240_v15, 0.0  ;;  %v2243_v32 = vadd.f32 %v2774_v0, %v2100_v29 }
 0x730   :  { %v2258_v14 = vmax.f32 %v2232_v26, 0.0  ;;  %v2235_v27 = vadd.f32 %v2234_v11, %v2100_v29 }
 0x731   :  { %v2261_v33 = vmax.f32 %v2243_v32, 0.0 }
 0x732   :  { %2268 = vxpose.xlu0.b32.cont [7/16] (narrow) %v2252_v18, 64  ;;  %v2259_v28 = vmax.f32 %v2235_v27, 0.0 }
 0x736   :  { %2269 = vxpose.xlu0.b32.cont [8/16] (narrow) %v2253_v20, 64 }
 0x73a   :  { %2270 = vxpose.xlu0.b32.cont [9/16] (narrow) %v2254_v22, 64 }
 0x73e   :  { %2271 = vxpose.xlu0.b32.cont [10/16] (narrow) %v2255_v1, 64 }
 0x742   :  { %2272 = vxpose.xlu0.b32.cont [11/16] (narrow) %v2256_v3, 64 }
 0x746   :  { %2273 = vxpose.xlu0.b32.cont [12/16] (narrow) %v2257_v4, 64 }
 0x74a   :  { %2274 = vxpose.xlu0.b32.cont [13/16] (narrow) %v2258_v14, 64 }
 0x74e   :  { %2275 = vxpose.xlu0.b32.cont [14/16] (narrow) %v2259_v28, 64 }
 0x752   :  { %2276 = vxpose.xlu0.b32.cont [15/16] (narrow) %v2260_v31, 64 }
 0x756   :  { %2277 = vxpose.xlu0.b32.end [16/16] (narrow) %v2261_v33, 64 }
 0x77f   :  { %2874 = vset.pattern.permute.xlu0 %v3162_v16  ;;  %v2335_v16 = vpop.permute.xlu1 %2334 }
 0x783   :  { %v2340_v51 = vpop.permute.xlu1 %2339 }
 0x787   :  { %v2365_v59 = vpop.permute.xlu1 %2364 }
 0x788   :  { %v2373_v61 = vrot.slane %v2365_v59, %v2372_v57 }
 0x78a   :  { %v2378_v11 = vrot.slane %v2373_v61, %v2377_v63 }
 0x79a   :  { %v2278_v8 = vpop.trf.xlu0 }
 0x79b   :  { %v2342_v38 = vmul.f32 %v2305_v5, %v2278_v8 }
 0x79e   :  { %v2279_v35 = vpop.trf.xlu0 }
 0x79f   :  { %v2343_v12 = vmul.f32 %v2310_v7, %v2279_v35 }
 0x7a1   :  { %v2350_v29 = vadd.f32 %v2343_v12, %v2342_v38 }
 0x7a2   :  { %v2280_v36 = vpop.trf.xlu0 }
 0x7a3   :  { %v2344_v30 = vmul.f32 %v2315_v6, %v2280_v36 }
 0x7a5   :  { %v2351_v41 = vadd.f32 %v2350_v29, %v2344_v30 }
 0x7a6   :  { %v2281_v10 = vpop.trf.xlu0 }
 0x7a7   :  { %v2345_v39 = vmul.f32 %v2320_v34, %v2281_v10 }
 0x7a9   :  { %v2352_v43 = vadd.f32 %v2351_v41, %v2345_v39 }
 0x7aa   :  { %v2282_v37 = vpop.trf.xlu0 }
 0x7ab   :  { %v2346_v42 = vmul.f32 %v2325_v9, %v2282_v37 }
 0x7ad   :  { %v2353_v46 = vadd.f32 %v2352_v43, %v2346_v42 }
 0x7ae   :  { %v2283_v40 = vpop.trf.xlu0 }
 0x7af   :  { %v2347_v44 = vmul.f32 %v2330_v17, %v2283_v40 }
 0x7b1   :  { %v2354_v50 = vadd.f32 %v2353_v46, %v2347_v44 }
 0x7b2   :  { %v2284_v45 = vpop.trf.xlu0 }
 0x7b3   :  { %v2348_v47 = vmul.f32 %v2335_v16, %v2284_v45 }
 0x7b5   :  { %v2355_v53 = vadd.f32 %v2354_v50, %v2348_v47 }
 0x7b6   :  { %v2285_v52 = vpop.trf.xlu0 }
 0x7b7   :  { %v2349_v25 = vmul.f32 %v2340_v51, %v2285_v52 }
 0x7b9   :  { %v2356_v55 = vadd.f32 %v2355_v53, %v2349_v25 }
 0x7bb   :  { %v2357_v56 = vrot.slane %v2356_v55, 4 }
 0x7bd   :  { %v2358_v58 = vadd.f32 %v2357_v56, %v2356_v55 }
 0x7bf   :  { %v2359_v60 = vrot.slane %v2358_v58, 2 }
 0x7c1   :  { %v2360_v62 = vadd.f32 %v2359_v60, %v2358_v58 }
 0x7c3   :  { %v2361_v0 = vrot.slane %v2360_v62, 1 }
 0x7c5   :  { %v2362_v18 = vadd.f32 %v2361_v0, %v2360_v62 }
 0x7c7   :  { %v2380_v19 = vadd.f32 %v2378_v11, %v2362_v18 }
 0x7c9   :  { %2381 = vst [vmem:[%s3562_s8] sm:$0x1] %v2380_v19 }
 0x7ca   :  { %2386 = vsyncpa [#allocation3], 1 }

</bundles_post_ra>
